<compile_context>
chip_gen: v7x
topology: tpu7x:2x2x1
jax: 0.10.0
libtpu: 0.0.40
codegen_flags: <defaults>
</compile_context>

<pallas_src>
import functools

import jax
import jax.numpy as jnp
from jax import lax
from jax.experimental import pallas as pl
from jax.experimental.pallas import tpu as pltpu


# ----------------------------- fused PAM kernel -----------------------------
def _pam_kernel(x_ref, wq_ref, bq_ref, wk_ref, bk_ref, wv_ref, bv_ref,
                gamma_ref, x3_ref, out_ref, k_scr, v_scr, *, tq, exp_dtype):
    # x_ref  : (D*C, HW) bf16  x_2d for one batch, rows ordered (d, c) [resident]
    # w*_ref : block-diagonal (depth-folded) 1x1x1 conv weights, bf16
    # x3_ref : (D*C, TQ) bf16 residual tile; out_ref: (D*C, TQ) f32 output tile
    qi = pl.program_id(1)

    # K / V projections: one matmul each, computed once per batch element.
    @pl.when(qi == 0)
    def _project_kv():
        x = x_ref[...]                                                    # (DC, HW)
        k_scr[...] = (jnp.dot(wk_ref[...], x,
                              preferred_element_type=jnp.float32)
                      + bk_ref[...]).astype(k_scr.dtype)
        v_scr[...] = (jnp.dot(wv_ref[...], x,
                              preferred_element_type=jnp.float32)
                      + bv_ref[...]).astype(v_scr.dtype)

    # Q for this query tile only (each position's Q computed exactly once).
    qs = pl.multiple_of(qi * tq, tq)
    x_t = x_ref[:, pl.ds(qs, tq)]                                         # (DC, TQ)
    q_t = (jnp.dot(wq_ref[...], x_t, preferred_element_type=jnp.float32)
           + bq_ref[...]).astype(k_scr.dtype)                             # (DCq, TQ)

    # energy[p, t] = sum_m K[m, p] * Q[m, t]  -> (HW, TQ)  (key positions on
    # the sublane axis so the output matmul below needs no slab transpose).
    energy = lax.dot_general(k_scr[...], q_t, (((0,), (0,)), ((), ())),
                             preferred_element_type=jnp.float32)          # (HW, TQ)

    m = jnp.max(energy, axis=0, keepdims=True)                            # (1, TQ)
    e = jnp.exp((energy - m).astype(exp_dtype))                           # (HW, TQ)
    denom = jnp.sum(e, axis=0, keepdims=True, dtype=jnp.float32)          # (1, TQ)

    # out_un[m, t] = sum_p V[m, p] * e[p, t]   (plain A @ B, no transpose)
    out_un = jnp.dot(v_scr[...], e.astype(v_scr.dtype),
                     preferred_element_type=jnp.float32)                  # (DC, TQ)

    # Deferred softmax normalization on the small (DC, TQ) result + residual.
    inv = pl.reciprocal(denom)                                            # exact, tiny
    out_ref[...] = (gamma_ref[0, 0] * out_un * inv
                    + x3_ref[...].astype(jnp.float32)).astype(out_ref.dtype)


# ------------------------------- helpers -------------------------------------
def _device_kind():
    try:
        return jax.devices()[0].device_kind.lower()
    except Exception:
        return ""


def _default_exp_dtype():
    kind = _device_kind()
    # bf16 EUP exp only pays off on v6e/v7x; v5e and older lack bf16 EUP/VPU.
    return jnp.bfloat16 if ("v6" in kind or "v7" in kind) else jnp.float32


def _default_tq(hw):
    kind = _device_kind()
    cap = 512 if "v6" in kind else (384 if "v7" in kind else 256)
    if hw % 128 != 0:
        # TODO(synk): pad HW to a multiple of 128 (with key masking) instead of
        # falling back to a full-HW, lane-misaligned tile.
        return hw
    best, t = 128, 128
    while t <= min(cap, hw):
        if hw % t == 0:
            best = t
        t += 128
    return best


# ------------------------------- wrapper --------------------------------------
def pam_module(x_2d, x_3d, params, *, tq=None, exp_dtype=None):
    """PAM_Module.forward(x2d, x3d) -> (B, C, H, W, D)."""
    B, C, H, W, D = x_2d.shape
    HW = H * W
    Cq = params["wq"].shape[0]
    DC, DCq = D * C, D * Cq
    f32, bf16 = jnp.float32, jnp.bfloat16

    if tq is None:
        tq = _default_tq(HW)
    assert HW % tq == 0
    n_q = HW // tq
    if exp_dtype is None:
        exp_dtype = _default_exp_dtype()

    # Fold depth into the channel axis via block-diagonal weights so the
    # 1x1x1 conv over all depth slices is a single matmul (rows ordered (d,c)).
    # TODO(synk): for large D or C replace the kron (D^2*C^2 weight bytes, Dx
    # wasted MXU flops) with D per-depth (C x C) matmuls inside the qi==0 branch.
    eye = jnp.eye(D, dtype=f32)
    wq_f = jnp.kron(eye, params["wq"].astype(f32)).astype(bf16)  # (D*Cq, D*C)
    wk_f = jnp.kron(eye, params["wk"].astype(f32)).astype(bf16)
    wv_f = jnp.kron(eye, params["wv"].astype(f32)).astype(bf16)  # (D*C , D*C)
    bq_f = jnp.tile(params["bq"].astype(f32), D).reshape(DCq, 1)
    bk_f = jnp.tile(params["bk"].astype(f32), D).reshape(DCq, 1)
    bv_f = jnp.tile(params["bv"].astype(f32), D).reshape(DC, 1)
    gamma = jnp.asarray(params["gamma"], f32).reshape(1, 1)

    # Layout glue (B,C,H,W,D)->(B,D*C,HW), done in bf16 to halve HBM passes.
    # TODO(synk): have the upstream layer emit (B, D*C, HW) directly to drop it.
    x2 = jnp.transpose(x_2d.astype(bf16), (0, 4, 1, 2, 3)).reshape(B, DC, HW)
    x3 = jnp.transpose(x_3d.astype(bf16), (0, 4, 1, 2, 3)).reshape(B, DC, HW)

    def const(shape):
        return pl.BlockSpec(shape, lambda b, q: (0, 0))

    # Explicit VMEM budget: x slab (double-buffered) + K/V scratch + x3/out
    # tiles + weights + ~4 (HW, TQ) softmax temporaries.  Only raise the scoped
    # limit if the budget exceeds the 32 MiB default.
    vmem_needed = (
        2 * DC * HW * 2                        # x slab, double-buffered, bf16
        + (DCq + DC) * HW * 2                  # K + V scratch, bf16
        + 2 * DC * tq * 2 + 2 * DC * tq * 4    # x3 tile (bf16) + out tile (f32)
        + 2 * (2 * DCq * DC + DC * DC) * 2     # folded weights, bf16
        + 4 * HW * tq * 4                      # energy / exp temporaries
    )
    vmem_limit = max(32 << 20, min(int(1.5 * vmem_needed), 64 << 20))

    out = pl.pallas_call(
        functools.partial(_pam_kernel, tq=tq, exp_dtype=exp_dtype),
        out_shape=jax.ShapeDtypeStruct((B, DC, HW), f32),
        grid=(B, n_q),
        in_specs=[
            pl.BlockSpec((None, DC, HW), lambda b, q: (b, 0, 0)),   # x_2d (resident/batch)
            const((DCq, DC)), const((DCq, 1)),                      # wq, bq
            const((DCq, DC)), const((DCq, 1)),                      # wk, bk
            const((DC, DC)), const((DC, 1)),                        # wv, bv
            pl.BlockSpec(memory_space=pltpu.MemorySpace.SMEM),      # gamma scalar
            pl.BlockSpec((None, DC, tq), lambda b, q: (b, 0, q)),   # residual tile
        ],
        out_specs=pl.BlockSpec((None, DC, tq), lambda b, q: (b, 0, q)),
        scratch_shapes=[pltpu.VMEM((DCq, HW), bf16),                # K
                        pltpu.VMEM((DC, HW), bf16)],                # V
        compiler_params=pltpu.CompilerParams(
            dimension_semantics=("parallel", "arbitrary"),
            vmem_limit_bytes=vmem_limit),
        # TODO(synk): on v7x with B == 1 (or odd), add a 2-way core-split axis
        # over query tiles (grid=(B, 2, n_q//2), middle axis "parallel") and
        # re-gate the K/V projection on the innermost index so both
        # TensorCores build their own K/V scratch.
    )(x2, wq_f, bq_f, wk_f, bk_f, wv_f, bv_f, gamma, x3)

    # (B, D*C, HW) -> (B, D, C, H, W) -> (B, C, H, W, D)
    return jnp.transpose(out.reshape(B, D, C, H, W), (0, 2, 3, 4, 1))


# ----------------------------- pure-JAX reference ----------------------------
def reference(x_2d, x_3d, params):
    HIGH = lax.Precision.HIGHEST
    wq, bq = params["wq"], params["bq"]
    wk, bk = params["wk"], params["bk"]
    wv, bv = params["wv"], params["bv"]
    gamma = params["gamma"]
    B, C, H, W, D = x_2d.shape

    x2 = jnp.transpose(x_2d, (0, 1, 4, 2, 3))                     # (B, C, D, H, W)

    def conv1x1(x, w, b):
        return (jnp.einsum("oc,bcdhw->bodhw", w, x, precision=HIGH)
                + b[None, :, None, None, None])

    q = conv1x1(x2, wq, bq).reshape(B, -1, H * W)                 # (B, Cq*D, HW)
    k = conv1x1(x2, wk, bk).reshape(B, -1, H * W)
    v = conv1x1(x2, wv, bv).reshape(B, -1, H * W)                 # (B, C*D , HW)
    energy = jnp.einsum("bmp,bmq->bpq", q, k, precision=HIGH)     # (B, HW, HW)
    att = jax.nn.softmax(energy, axis=-1)
    out = jnp.einsum("bmq,bpq->bmp", v, att, precision=HIGH)      # (B, C*D, HW)
    out = jnp.transpose(out.reshape(B, C, D, H, W), (0, 1, 3, 4, 2))
    return gamma * out + x_3d


if __name__ == "__main__":
    # in_dim=C channels-first 5-D inputs (B, C, H, W, D); Cq = C // 8.
    B, C, H, W, D = 2, 16, 16, 16, 4
    Cq = C // 8

    key = jax.random.PRNGKey(0)
    keys = jax.random.split(key, 8)
    params = dict(
        wq=jax.random.normal(keys[0], (Cq, C), jnp.float32) * 0.2,
        bq=jax.random.normal(keys[1], (Cq,), jnp.float32) * 0.1,
        wk=jax.random.normal(keys[2], (Cq, C), jnp.float32) * 0.2,
        bk=jax.random.normal(keys[3], (Cq,), jnp.float32) * 0.1,
        wv=jax.random.normal(keys[4], (C, C), jnp.float32) * 0.2,
        bv=jax.random.normal(keys[5], (C,), jnp.float32) * 0.1,
        # PyTorch inits gamma to 0 (which would zero the attention branch);
        # use a nonzero value so the kernel path is actually exercised.
        gamma=0.5,
    )
    x_2d = jax.random.normal(keys[6], (B, C, H, W, D), jnp.float32) * 0.5
    x_3d = jax.random.normal(keys[7], (B, C, H, W, D), jnp.float32) * 0.5

    out = pam_module(x_2d, x_3d, params)
    out = jax.block_until_ready(out)

    ref = reference(x_2d, x_3d, params)
    assert out.shape == (B, C, H, W, D), out.shape
    max_err = float(jnp.max(jnp.abs(out - ref)))
    assert jnp.allclose(out, ref, rtol=2e-2, atol=2e-2), f"max abs err = {max_err}"
    print("KERNEL_OK")
</pallas_src>

<mosaic_0001>
module attributes {stable_mosaic.version = 11 : i64} {
  func.func @_pam_kernel(%arg0: i32, %arg1: i32, %arg2: memref<1x64x256xbf16, #tpu.memory_space<vmem>>, %arg3: memref<8x64xbf16, #tpu.memory_space<vmem>>, %arg4: memref<8x1xf32, #tpu.memory_space<vmem>>, %arg5: memref<8x64xbf16, #tpu.memory_space<vmem>>, %arg6: memref<8x1xf32, #tpu.memory_space<vmem>>, %arg7: memref<64x64xbf16, #tpu.memory_space<vmem>>, %arg8: memref<64x1xf32, #tpu.memory_space<vmem>>, %arg9: memref<1x1xf32, #tpu.memory_space<smem>>, %arg10: memref<1x64x256xbf16, #tpu.memory_space<vmem>>, %arg11: memref<1x64x256xf32, #tpu.memory_space<vmem>>, %arg12: memref<8x256xbf16, #tpu.memory_space<vmem>>, %arg13: memref<64x256xbf16, #tpu.memory_space<vmem>>) attributes {dimension_semantics = [#tpu.dimension_semantics<parallel>, #tpu.dimension_semantics<arbitrary>], iteration_bounds = array<i64: 2, 1>, scalar_prefetch = 0 : i64, scratch_operands = 2 : i64, tpu.core_type = #tpu.core_type<tc>, window_params = [{transform_indices = @transform_0, window_bounds = array<i64: 1, 64, 256>}, {pipeline_mode = #tpu.pipeline_mode<synchronous>, transform_indices = @transform_1, window_bounds = array<i64: 8, 64>}, {pipeline_mode = #tpu.pipeline_mode<synchronous>, transform_indices = @transform_2, window_bounds = array<i64: 8, 1>}, {pipeline_mode = #tpu.pipeline_mode<synchronous>, transform_indices = @transform_3, window_bounds = array<i64: 8, 64>}, {pipeline_mode = #tpu.pipeline_mode<synchronous>, transform_indices = @transform_4, window_bounds = array<i64: 8, 1>}, {pipeline_mode = #tpu.pipeline_mode<synchronous>, transform_indices = @transform_5, window_bounds = array<i64: 64, 64>}, {pipeline_mode = #tpu.pipeline_mode<synchronous>, transform_indices = @transform_6, window_bounds = array<i64: 64, 1>}, {transform_indices = @transform_7, window_bounds = array<i64: 1, 1>}, {transform_indices = @transform_8, window_bounds = array<i64: 1, 64, 256>}, {transform_indices = @transform_9, window_bounds = array<i64: 1, 64, 256>}]} {
    %c0_i32 = arith.constant 0 : i32
    %0 = arith.cmpi eq, %arg1, %c0_i32 : i32
    %1 = arith.extui %0 : i1 to i32
    %c0_i32_0 = arith.constant 0 : i32
    %2 = arith.cmpi ne, %1, %c0_i32_0 : i32
    scf.if %2 {
      %c0_22 = arith.constant 0 : index
      %c0_23 = arith.constant 0 : index
      %c0_24 = arith.constant 0 : index
      %39 = vector.load %arg2[%c0_22, %c0_23, %c0_24] : memref<1x64x256xbf16, #tpu.memory_space<vmem>>, vector<1x64x256xbf16>
      %40 = vector.shape_cast %39 : vector<1x64x256xbf16> to vector<64x256xbf16>
      %c0_25 = arith.constant 0 : index
      %c0_26 = arith.constant 0 : index
      %41 = vector.load %arg5[%c0_25, %c0_26] : memref<8x64xbf16, #tpu.memory_space<vmem>>, vector<8x64xbf16>
      %cst_27 = arith.constant dense<0.000000e+00> : vector<8x256xf32>
      %42 = tpu.matmul %41, %40, %cst_27 {dimension_numbers = #tpu.dot_dimension_numbers<[1], [0], [0], [1], [0, 0, 1, 1], [], []>} : vector<8x64xbf16>, vector<64x256xbf16>, vector<8x256xf32> -> vector<8x256xf32>
      %c0_28 = arith.constant 0 : index
      %c0_29 = arith.constant 0 : index
      %43 = vector.load %arg6[%c0_28, %c0_29] : memref<8x1xf32, #tpu.memory_space<vmem>>, vector<8x1xf32>
      %44 = vector.broadcast %43 : vector<8x1xf32> to vector<8x256xf32>
      %45 = arith.addf %42, %44 : vector<8x256xf32>
      %46 = arith.truncf %45 : vector<8x256xf32> to vector<8x256xbf16>
      %c0_30 = arith.constant 0 : index
      %c0_31 = arith.constant 0 : index
      %47 = vector.load %arg12[%c0_30, %c0_31] : memref<8x256xbf16, #tpu.memory_space<vmem>>, vector<8x256xbf16>
      tpu.vector_store %arg12[%c0_30, %c0_31], %46 {strides = array<i32>} : memref<8x256xbf16, #tpu.memory_space<vmem>>, vector<8x256xbf16>,
      %c0_32 = arith.constant 0 : index
      %c0_33 = arith.constant 0 : index
      %48 = vector.load %arg7[%c0_32, %c0_33] : memref<64x64xbf16, #tpu.memory_space<vmem>>, vector<64x64xbf16>
      %cst_34 = arith.constant dense<0.000000e+00> : vector<64x256xf32>
      %49 = tpu.matmul %48, %40, %cst_34 {dimension_numbers = #tpu.dot_dimension_numbers<[1], [0], [0], [1], [0, 0, 1, 1], [], []>} : vector<64x64xbf16>, vector<64x256xbf16>, vector<64x256xf32> -> vector<64x256xf32>
      %c0_35 = arith.constant 0 : index
      %c0_36 = arith.constant 0 : index
      %50 = vector.load %arg8[%c0_35, %c0_36] : memref<64x1xf32, #tpu.memory_space<vmem>>, vector<64x1xf32>
      %51 = vector.broadcast %50 : vector<64x1xf32> to vector<64x256xf32>
      %52 = arith.addf %49, %51 : vector<64x256xf32>
      %53 = arith.truncf %52 : vector<64x256xf32> to vector<64x256xbf16>
      %c0_37 = arith.constant 0 : index
      %c0_38 = arith.constant 0 : index
      %54 = vector.load %arg13[%c0_37, %c0_38] : memref<64x256xbf16, #tpu.memory_space<vmem>>, vector<64x256xbf16>
      tpu.vector_store %arg13[%c0_37, %c0_38], %53 {strides = array<i32>} : memref<64x256xbf16, #tpu.memory_space<vmem>>, vector<64x256xbf16>,
    } else {
    }
    %c256_i32 = arith.constant 256 : i32
    %3 = arith.muli %arg1, %c256_i32 : i32
    %4 = tpu.assume_multiple %3, 256 : i32
    %c0 = arith.constant 0 : index
    %c0_1 = arith.constant 0 : index
    %5 = arith.index_cast %4 : i32 to index
    %6 = vector.load %arg2[%c0, %c0_1, %5] : memref<1x64x256xbf16, #tpu.memory_space<vmem>>, vector<1x64x256xbf16>
    %7 = vector.shape_cast %6 : vector<1x64x256xbf16> to vector<64x256xbf16>
    %c0_2 = arith.constant 0 : index
    %c0_3 = arith.constant 0 : index
    %8 = vector.load %arg3[%c0_2, %c0_3] : memref<8x64xbf16, #tpu.memory_space<vmem>>, vector<8x64xbf16>
    %cst = arith.constant dense<0.000000e+00> : vector<8x256xf32>
    %9 = tpu.matmul %8, %7, %cst {dimension_numbers = #tpu.dot_dimension_numbers<[1], [0], [0], [1], [0, 0, 1, 1], [], []>} : vector<8x64xbf16>, vector<64x256xbf16>, vector<8x256xf32> -> vector<8x256xf32>
    %c0_4 = arith.constant 0 : index
    %c0_5 = arith.constant 0 : index
    %10 = vector.load %arg4[%c0_4, %c0_5] : memref<8x1xf32, #tpu.memory_space<vmem>>, vector<8x1xf32>
    %11 = vector.broadcast %10 : vector<8x1xf32> to vector<8x256xf32>
    %12 = arith.addf %9, %11 : vector<8x256xf32>
    %13 = arith.truncf %12 : vector<8x256xf32> to vector<8x256xbf16>
    %c0_6 = arith.constant 0 : index
    %c0_7 = arith.constant 0 : index
    %14 = vector.load %arg12[%c0_6, %c0_7] : memref<8x256xbf16, #tpu.memory_space<vmem>>, vector<8x256xbf16>
    %cst_8 = arith.constant dense<0.000000e+00> : vector<256x256xf32>
    %15 = tpu.matmul %14, %13, %cst_8 {dimension_numbers = #tpu.dot_dimension_numbers<[0], [0], [1], [1], [0, 1, 1, 1], [], []>} : vector<8x256xbf16>, vector<8x256xbf16>, vector<256x256xf32> -> vector<256x256xf32>
    %cst_9 = arith.constant dense<0xFF800000> : vector<256xf32>
    %16 = vector.multi_reduction <maximumf>, %15, %cst_9 [0] : vector<256x256xf32> to vector<256xf32>
    %17 = vector.shape_cast %16 : vector<256xf32> to vector<1x256xf32>
    %18 = vector.broadcast %17 : vector<1x256xf32> to vector<256x256xf32>
    %19 = arith.subf %15, %18 : vector<256x256xf32>
    %20 = math.exp %19 : vector<256x256xf32>
    %cst_10 = arith.constant dense<0.000000e+00> : vector<256xf32>
    %21 = vector.multi_reduction <add>, %20, %cst_10 [0] : vector<256x256xf32> to vector<256xf32>
    %22 = vector.shape_cast %21 : vector<256xf32> to vector<1x256xf32>
    %c0_11 = arith.constant 0 : index
    %c0_12 = arith.constant 0 : index
    %23 = vector.load %arg13[%c0_11, %c0_12] : memref<64x256xbf16, #tpu.memory_space<vmem>>, vector<64x256xbf16>
    %24 = arith.truncf %20 : vector<256x256xf32> to vector<256x256xbf16>
    %cst_13 = arith.constant dense<0.000000e+00> : vector<64x256xf32>
    %25 = tpu.matmul %23, %24, %cst_13 {dimension_numbers = #tpu.dot_dimension_numbers<[1], [0], [0], [1], [0, 0, 1, 1], [], []>} : vector<64x256xbf16>, vector<256x256xbf16>, vector<64x256xf32> -> vector<64x256xf32>
    %26 = tpu.reciprocal %22 : vector<1x256xf32> -> vector<1x256xf32>
    %c0_14 = arith.constant 0 : index
    %c0_15 = arith.constant 0 : index
    %27 = memref.load %arg9[%c0_14, %c0_15] : memref<1x1xf32, #tpu.memory_space<smem>>
    %28 = vector.broadcast %27 : f32 to vector<64x256xf32>
    %29 = arith.mulf %28, %25 : vector<64x256xf32>
    %30 = vector.broadcast %26 : vector<1x256xf32> to vector<64x256xf32>
    %31 = arith.mulf %29, %30 : vector<64x256xf32>
    %c0_16 = arith.constant 0 : index
    %c0_17 = arith.constant 0 : index
    %c0_18 = arith.constant 0 : index
    %32 = vector.load %arg10[%c0_16, %c0_17, %c0_18] : memref<1x64x256xbf16, #tpu.memory_space<vmem>>, vector<1x64x256xbf16>
    %33 = vector.shape_cast %32 : vector<1x64x256xbf16> to vector<64x256xbf16>
    %34 = arith.extf %33 : vector<64x256xbf16> to vector<64x256xf32>
    %35 = arith.addf %31, %34 : vector<64x256xf32>
    %c0_19 = arith.constant 0 : index
    %c0_20 = arith.constant 0 : index
    %c0_21 = arith.constant 0 : index
    %36 = vector.load %arg11[%c0_19, %c0_20, %c0_21] : memref<1x64x256xf32, #tpu.memory_space<vmem>>, vector<1x64x256xf32>
    %37 = vector.shape_cast %36 : vector<1x64x256xf32> to vector<64x256xf32>
    %38 = vector.shape_cast %35 : vector<64x256xf32> to vector<1x64x256xf32>
    tpu.vector_store %arg11[%c0_19, %c0_20, %c0_21], %38 {strides = array<i32>} : memref<1x64x256xf32, #tpu.memory_space<vmem>>, vector<1x64x256xf32>,
    return
  }
  func.func @transform_0(%arg0: i32, %arg1: i32) -> (i32, i32, i32) {
    %c0_i32 = arith.constant 0 : i32
    %c0_i32_0 = arith.constant 0 : i32
    %c0_i32_1 = arith.constant 0 : i32
    return %arg0, %c0_i32, %c0_i32_0 : i32, i32, i32
  }
  func.func @transform_1(%arg0: i32, %arg1: i32) -> (i32, i32) {
    %c0_i32 = arith.constant 0 : i32
    %c0_i32_0 = arith.constant 0 : i32
    %c0_i32_1 = arith.constant 0 : i32
    return %c0_i32, %c0_i32_0 : i32, i32
  }
  func.func @transform_2(%arg0: i32, %arg1: i32) -> (i32, i32) {
    %c0_i32 = arith.constant 0 : i32
    %c0_i32_0 = arith.constant 0 : i32
    %c0_i32_1 = arith.constant 0 : i32
    return %c0_i32, %c0_i32_0 : i32, i32
  }
  func.func @transform_3(%arg0: i32, %arg1: i32) -> (i32, i32) {
    %c0_i32 = arith.constant 0 : i32
    %c0_i32_0 = arith.constant 0 : i32
    %c0_i32_1 = arith.constant 0 : i32
    return %c0_i32, %c0_i32_0 : i32, i32
  }
  func.func @transform_4(%arg0: i32, %arg1: i32) -> (i32, i32) {
    %c0_i32 = arith.constant 0 : i32
    %c0_i32_0 = arith.constant 0 : i32
    %c0_i32_1 = arith.constant 0 : i32
    return %c0_i32, %c0_i32_0 : i32, i32
  }
  func.func @transform_5(%arg0: i32, %arg1: i32) -> (i32, i32) {
    %c0_i32 = arith.constant 0 : i32
    %c0_i32_0 = arith.constant 0 : i32
    %c0_i32_1 = arith.constant 0 : i32
    return %c0_i32, %c0_i32_0 : i32, i32
  }
  func.func @transform_6(%arg0: i32, %arg1: i32) -> (i32, i32) {
    %c0_i32 = arith.constant 0 : i32
    %c0_i32_0 = arith.constant 0 : i32
    %c0_i32_1 = arith.constant 0 : i32
    return %c0_i32, %c0_i32_0 : i32, i32
  }
  func.func @transform_7(%arg0: i32, %arg1: i32) -> (i32, i32) {
    %c0_i32 = arith.constant 0 : i32
    %c0_i32_0 = arith.constant 0 : i32
    %c0_i32_1 = arith.constant 0 : i32
    return %c0_i32, %c0_i32_0 : i32, i32
  }
  func.func @transform_8(%arg0: i32, %arg1: i32) -> (i32, i32, i32) {
    %c0_i32 = arith.constant 0 : i32
    %c0_i32_0 = arith.constant 0 : i32
    return %arg0, %c0_i32, %arg1 : i32, i32, i32
  }
  func.func @transform_9(%arg0: i32, %arg1: i32) -> (i32, i32, i32) {
    %c0_i32 = arith.constant 0 : i32
    %c0_i32_0 = arith.constant 0 : i32
    return %arg0, %c0_i32, %arg1 : i32, i32, i32
  }
}

</mosaic_0001>

<bundles_post_ra>
// kernel: tpu_custom_call.1
= control target key start
LH: loop header
LB: loop body
LE: loop exit
PB: predicated region body
PF: predicated region fallthrough
CT: control target
= control target key end

     0   :  { %s3374_s0 = inlined_call_operand.hbm [shape: bf16[2,64,256], index: 0, kind: input, shape index: {}]   ;;  %s3375_s1 = inlined_call_operand.vmem [shape: bf16[8,64], index: 1, kind: input, shape index: {}]   ;;  %s3376_s2 = inlined_call_operand.vmem [shape: f32[8,1], index: 2, kind: input, shape index: {}]   ;;  %s3377_s3 = inlined_call_operand.vmem [shape: bf16[8,64], index: 3, kind: input, shape index: {}]   ;;  %s3378_s4 = inlined_call_operand.vmem [shape: f32[8,1], index: 4, kind: input, shape index: {}]   ;;  %s3379_s5 = inlined_call_operand.vmem [shape: bf16[64,64], index: 5, kind: input, shape index: {}]   ;;  %s3380_s6 = inlined_call_operand.vmem [shape: f32[64,1], index: 6, kind: input, shape index: {}]   ;;  %s3381_s7 = inlined_call_operand.<no memory space> [shape: f32[1,1], index: 7, kind: input, shape index: {}]   ;;  %s3382_s8 = inlined_call_operand.hbm [shape: bf16[2,64,256], index: 8, kind: input, shape index: {}]   ;;  %s3383_s9 = inlined_call_operand.hbm [shape: f32[2,64,256], index: 9, kind: output, shape index: {}]  }
   0x1   :  { %3447 = sst [smem:[#allocation52_spill]] %s3374_s0 }
   0x2   :  { %14 = sst [smem:[#allocation4]] %s3381_s7 }
   0x3   :  { %15 = vsyncpa [#allocation6], 0 }
   0x4   :  { %17 = vsyncpa [#allocation6 + $0x1], 0 }
   0x5   :  { %18 = vsyncpa [#allocation9], 0 }
   0x6   :  { %20 = vsyncpa [#allocation9 + $0x1], 0 }
   0x7   :  { %21 = vsyncpa [#allocation7], 0 }
   0x8   :  { %23 = vsyncpa [#allocation7 + $0x1], 0  ;;  %s2274_s11 = smov 0   ;;  %s2276_s12 = smov 0  }
   0x9   :  { %s2278_s13 = smov 0   ;;  %s2280_s14 = smov 0  }
   0xa   :  { %s2282_s15 = smov 0   ;;  %s2284_s16 = smov 0  }
   0xb LB: > { %3448 = sst [smem:[#allocation14_spill]] %s2199_s13  ;;  %s1772_s7 = sadd.s32 4294967295, %s2211_s16   ;;  %s2211_s16 = sphi %s2284_s16, %s29_s16   ;;  %s2207_s15 = sphi %s2282_s15, %s3610_s15   ;;  %s2203_s14 = sphi %s2280_s14, %s3609_s14   ;;  %s2199_s13 = sphi %s2278_s13, %s3605_s13   ;;  %s2195_s12 = sphi %s2276_s12, %s3608_s12   ;;  %s2191_s11 = sphi %s2274_s11, %s3607_s11  }
   0xc   : > { %s1773_s17 = sadd.s32 4294967294, %s2211_s16   ;;  %s41_s18 = sadd.s32 1, %s2207_s15 }
   0xd   : > { %s48_s19 = sadd.s32 1, %s2199_s13  ;;  %p43_p0 = scmp.ge.s32.totalorder %s41_s18, 2 }
   0xe   : > { %p55_p1 = scmp.ne.s32.totalorder %s2199_s13, %s2195_s12  ;;  %p56_p2 = scmp.eq.s32.totalorder %s2211_s16, 0 }
   0xf   : > { %p61_p3 = scmp.ne.s32.totalorder %s2195_s12, %s2191_s11  ;;  %s3612_s18 = smov (%p43_p0, %s41_s18), 0 }
  0x10   : > { %3449 = sst [smem:[#allocation15_spill]] %s3612_s18  ;;  %p2315_p4 = por %p56_p2, %p55_p1 }
  0x11   : > { %p62_p5 = scmp.eq.s32.totalorder %s1772_s7, 0  ;;  %s45_s21 = ssub.s32 %s2207_s15, %s3612_s18 }
  0x12   : > { %p262_p6 = scmp.eq.s32.totalorder %s1772_s7, 1  ;;  %p46_p7 = scmp.eq.s32.totalorder %s45_s21, 0 }
  0x13   : > { %p2321_p8 = por %p62_p5, %p61_p3  ;;  %p268_p10 = scmp.eq.s32.totalorder %s1773_s17, 1 }
  0x14   : > { %p2325_p9 = por %p262_p6, %p55_p1  ;;  %p1860_p13 = scmp.lt.s32.totalorder %s2211_s16, 2 }
  0x15   : > { %s3451_s22 = scalar_select %p2321_p8, 1, 0 }
  0x16   : > { %s3452_s23 = scalar_select %p2325_p9, 1, 0 }
  0x17   : > { %s2330_s24 = scalar_select %p46_p7, %s2199_s13, %s48_s19  }
  0x18   : > { %p2332_p11 = por %p268_p10, %p61_p3  ;;  %s2339_s26 = sand.u32 1, %s2199_s13  }
  0x19   : > { %3453 = sst [smem:[#allocation16_spill]] %s2330_s24  ;;  %s3384_s27 = sshll.u32 %s2339_s26, 6 }
  0x1a   : > { %s3454_s25 = scalar_select %p2332_p11, 1, 0 }
  0x1b   : > { %s3385_s28 = sshll.u32 %s2207_s15, 10  ;;  %s3455_s0 = sld [smem:[#allocation52_spill]] }
  0x1c   : > { %s313_s7 = scalar_lea.vmem [#allocation5], %s3384_s27  ;;  %p2356_p0 = pnand %p1860_p13, %p2315_p4 }
  0x1d   : > { %s320_s17 = sshll.u32 %s313_s7, 4  ;;  %s2352_s17 = int_to_ptr.vmem [resolvable:$true] %s320_s17 }
  0x1e   : > { %p2067_p3 = pneg %p2356_p0 }
  0x21   : > { %s2348_s10 = scalar_lea.hbm %s3455_s0, %s3385_s28  ;;  %s2070_s20 = scalar_lea.hbm %s3455_s0, 2048 }
  0x22   : > { %s2065_s29 = scalar_lea.hbm %s2348_s10, 1024  ;;  %p2071_p4 = scmp.lt.u32.totalorder %s2348_s10, %s3455_s0 }
  0x23   : > { %p2066_p2 = scmp.ne.s32.totalorder %s2348_s10, %s2065_s29  ;;  %p2072_p7 = scmp.lt.u32.totalorder %s2070_s20, %s2065_s29 }
  0x24   : > { %p2074_p13 = scmp.lt.u32.totalorder %s2065_s29, %s2348_s10 }
  0x25   : > { %p2068_p5 = pnand %p2067_p3, %p2066_p2  ;;  %p2073_p10 = por %p2072_p7, %p2071_p4 }
  0x27   : > { %p2069_p6 = pneg %p2068_p5  ;;  %p2075_p12 = por %p2074_p13, %p2073_p10 }
  0x29   : > { %p2076_p1 = pnand %p2075_p12, %p2069_p6 }
  0x2b   : > { %2079 = shalt.err (!%p2076_p1)
}
  0x2c   : > { %s2080_s21 = scalar_lea.vmem %s2352_s17, 1024  ;;  %s2213_s30 = smov [#allocation5]  }
  0x2d   : > { %p2081_p2 = scmp.ne.s32.totalorder %s2352_s17, %s2080_s21  ;;  %s2085_s7 = sshll.u32 %s2213_s30, 4  ;;  %s2086_s7 = int_to_ptr.vmem [resolvable:$false] %s2085_s7 }
  0x2e   : > { %s2087_s27 = scalar_lea.vmem %s2086_s7, 2048  ;;  %p2088_p9 = scmp.lt.s32.totalorder %s2352_s17, %s2086_s7 }
  0x2f   : > { %p2083_p5 = pnand %p2081_p2, %p2067_p3  ;;  %p2089_p4 = scmp.lt.s32.totalorder %s2087_s27, %s2080_s21 }
  0x31   : > { %p2084_p11 = pneg %p2083_p5  ;;  %p2090_p7 = por %p2089_p4, %p2088_p9 }
  0x33   : > { %p2091_p10 = pnand %p2090_p7, %p2084_p11 }
  0x35   : > { %2094 = shalt.err (!%p2091_p10)
}
  0x36   : > { %s3389_s28 = smov 128   ;;  %s2215_s29 = smov 8  }
  0x37   : > { %s3457_s21 = scalar_lea.sflag [#allocation6], %s2339_s26  ;;  %p351_p9 = scmp.lt.s32.totalorder %s2211_s16, 3 }
  0x38   : > { %1852 = dma.hbm_to_vmem [thread:$0]  (!%p2356_p0), %s2348_s10, 1024, %s2352_s17, %s3457_s21, %s3389_s28, %s3389_s28, %s2215_s29  }
  0x39   : > { %s3458_s20 = sshll.u32 %s2207_s15, 10  ;;  %p3459_p11 = scmp.ge.s32.totalorder %s2211_s16, 1 }
  0x3a   : > { %s2398_s27 = scalar_lea.hbm %s3382_s8, %s3458_s20  ;;  %s3461_s18 = sshll.u32 %s2339_s26, 6 }
  0x3b   : > { %p2402_p12 = pnand %p3459_p11, %p351_p9  ;;  %s334_s24 = scalar_lea.vmem [#allocation8], %s3461_s18 }
  0x3c   : > { %s343_s13 = sshll.u32 %s334_s24, 4  ;;  %s331_s10 = scalar_lea.sflag [#allocation9], %s2339_s26  ;;  %s2408_s13 = int_to_ptr.vmem [resolvable:$true] %s343_s13 }
  0x3d   : > { %s2095_s17 = scalar_lea.hbm %s2398_s27, 1024  ;;  %s2100_s30 = scalar_lea.hbm %s3382_s8, 2048 }
  0x3e   : > { %p2096_p1 = scmp.ne.s32.totalorder %s2398_s27, %s2095_s17  ;;  %p2101_p2 = scmp.lt.u32.totalorder %s2398_s27, %s3382_s8 }
  0x3f   : > { %p2102_p5 = scmp.lt.u32.totalorder %s2100_s30, %s2095_s17  ;;  %p2104_p7 = scmp.lt.u32.totalorder %s2095_s17, %s2398_s27 }
  0x40   : > { %p2098_p6 = pnand %p2096_p1, %p2067_p3 }
  0x41   : > { %p2103_p4 = por %p2102_p5, %p2101_p2 }
  0x42   : > { %p2099_p13 = pneg %p2098_p6 }
  0x43   : > { %p2105_p10 = por %p2104_p7, %p2103_p4 }
  0x45   : > { %p2106_p9 = pnand %p2105_p10, %p2099_p13 }
  0x47   : > { %2109 = shalt.err (!%p2106_p9)
}
  0x48   : > { %s2110_s18 = scalar_lea.vmem %s2408_s13, 1024  ;;  %s2216_s24 = smov [#allocation8]  }
  0x49   : > { %p2111_p11 = scmp.ne.s32.totalorder %s2408_s13, %s2110_s18  ;;  %s2115_s21 = sshll.u32 %s2216_s24, 4  ;;  %s2116_s21 = int_to_ptr.vmem [resolvable:$false] %s2115_s21 }
  0x4a   : > { %s2117_s28 = scalar_lea.vmem %s2116_s21, 2048  ;;  %p2118_p8 = scmp.lt.s32.totalorder %s2408_s13, %s2116_s21 }
  0x4b   : > { %p2113_p1 = pnand %p2111_p11, %p2067_p3  ;;  %p2119_p2 = scmp.lt.s32.totalorder %s2117_s28, %s2110_s18 }
  0x4d   : > { %p2114_p6 = pneg %p2113_p1  ;;  %p2120_p5 = por %p2119_p2, %p2118_p8 }
  0x4f   : > { %p2121_p4 = pnand %p2120_p5, %p2114_p6 }
  0x51   : > { %2124 = shalt.err (!%p2121_p4)
}
  0x52   : > { %s3462_s17 = smov 128   ;;  %355 = sbr.rel (%p2402_p12) target bundleno = 1163 (0x48b), region = 56 }
  0x53   : > { %1855 = dma.hbm_to_vmem [thread:$0]  (!%p2356_p0), %s2398_s27, 1024, %s2408_s13, %s331_s10, %s3462_s17, %s3462_s17, %s2215_s29  }
  0x59   : > { %s2442_s20 = sand.u32 1, %s2195_s12   ;;  %p3463_p8 = scmp.ne.s32.totalorder %s3451_s22, 0 }
  0x5a   : > { %s1783_s30 = sshll.u32 %s2442_s20, 6  ;;  %s358_s7 = scalar_lea.sflag [#allocation6], %s2442_s20 }
  0x5b   : > { %s2446_s19 = scalar_lea.vmem [#allocation5], %s1783_s30 }
  0x5c   : > { %2178 = dma.done.wait (%p3463_p8), %s358_s7, 1024  }
  0x5d   : > { %2180 = vsyncadd (%p3463_p8), %s358_s7, 4294966272  ;;  %s367_s13 = scalar_lea.sflag [#allocation9], %s2442_s20  ;;  %s2453_s0 = scalar_lea.vmem [#allocation8], %s1783_s30 }
  0x5e   : > { %2182 = dma.done.wait (%p3463_p8), %s367_s13, 1024  }
  0x5f   : > { %2184 = vsyncadd (%p3463_p8), %s367_s13, 4294966272  ;;  %v2217_v0 = vmov 0   ;;  %v1917_v1 = vld [vmem:[%s2446_s19 + $0x4] ss:$8 sps:$4 sm:$0xff]   ;;  %v1919_v2 = vld [vmem:[%s2446_s19] ss:$8 sps:$4 sm:$0xff]  }
  0x60   : > { %508 = vmatprep.mubr.bf16.mxu1 %v2217_v0  ;;  %799 = vmatprep.mubr.bf16.mxu0 %v2217_v0  ;;  %v1920_v3 = vld [vmem:[%s2446_s19 + $0x14] ss:$8 sps:$4 sm:$0xff]   ;;  %v1922_v4 = vld [vmem:[%s2446_s19 + $0x10] ss:$8 sps:$4 sm:$0xff]   ;;  %v1923_v5 = vld [vmem:[%s2446_s19 + $0x24] ss:$8 sps:$4 sm:$0xff]  }
  0x61   : > { %1915 = vset.pattern.permute.xlu0 %v2217_v0  ;;  %476 = vmatprep.subr.bf16.mxu1 %v1917_v1  ;;  %v1925_v6 = vld [vmem:[%s2446_s19 + $0x20] ss:$8 sps:$4 sm:$0xff]   ;;  %v1926_v7 = vld [vmem:[%s2446_s19 + $0x34] ss:$8 sps:$4 sm:$0xff]   ;;  %v1928_v9 = vld [vmem:[%s2446_s19 + $0x30] ss:$8 sps:$4 sm:$0xff]  }
  0x62   : > { %767 = vmatprep.subr.bf16.mxu0 %v1917_v1  ;;  %477 = vmatpush1.bf16.msra.mxu1 %v1919_v2  ;;  %v426_v8 = vld [vmem:[%s3378_s4] sm:$0xff]  ;;  %vm472_vm0 = vcmask 523264   ;;  %v535_v14 = vld [vmem:[%s3380_s6 + $0x8] sm:$0xff]  ;;  %v536_v15 = vld [vmem:[%s3380_s6 + $0x10] sm:$0xff]  ;;  %vm899_vm1 = vcmask 1043456   ;;  %vm850_vm2 = vcmask 64512  }
  0x63   : > { %768 = vmatpush1.bf16.msra.mxu0 %v1919_v2  ;;  %478 = vmatprep.subr.bf16.mxu1 %v1920_v3  ;;  %v717_v10 = vld [vmem:[%s3376_s2] sm:$0xff]  ;;  %v537_v17 = vld [vmem:[%s3380_s6 + $0x18] sm:$0xff]  ;;  %v1930_v19 = vld [vmem:[%s3379_s5 + $0x8] sm:$0xff]   ;;  %s1554_s10 = sld [smem:[#allocation4]]  ;;  %s1785_s18 = sshll.u32 %s2442_s20, 7 }
  0x64   : > { %769 = vmatprep.subr.bf16.mxu0 %v1920_v3  ;;  %429 = vperm.xlu0 %1915, %v426_v8   ;;  %v425_v11 = vld [vmem:[%s3377_s3] sm:$0xf]  ;;  %v539_v20 = vld [vmem:[%s3380_s6 + $0x28] sm:$0xff]  ;;  %v540_v21 = vld [vmem:[%s3380_s6 + $0x30] sm:$0xff]  ;;  %s3271_s24 = scalar_lea.vmem [#allocation10], %s1785_s18  ;;  %p3601_p3 = scmp.ne.s32.totalorder %s3452_s23, 0 }
  0x65   : > { %v716_v12 = vld [vmem:[%s3375_s1] sm:$0xf]  ;;  %v1931_v22 = vld [vmem:[%s3379_s5 + $0x10] sm:$0xff]   ;;  %v1932_v23 = vld [vmem:[%s3379_s5 + $0x18] sm:$0xff]   ;;  %s1660_s21 = sshll.u32 %s3271_s24, 4  ;;  %s2218_s19 = smov [#allocation10]   ;;  %s3322_s21 = int_to_ptr.vmem [resolvable:$true] %s1660_s21 }
  0x66   : > { %479 = vmatpush1.bf16.msra.mxu1 %v1922_v4  ;;  %v534_v13 = vld [vmem:[%s3380_s6] sm:$0xff]  ;;  %s2125_s7 = scalar_lea.vmem %s3322_s21, 2048  ;;  %s2129_s13 = sshll.u32 %s2218_s19, 4  ;;  %s2130_s13 = int_to_ptr.vmem [resolvable:$false] %s2129_s13 }
  0x67   : > { %770 = vmatpush1.bf16.msra.mxu0 %v1922_v4  ;;  %480 = vmatprep.subr.bf16.mxu1 %v1923_v5  ;;  %v1929_v16 = vld [vmem:[%s3379_s5] sm:$0xff]   ;;  %p2126_p0 = scmp.ne.s32.totalorder %s3322_s21, %s2125_s7  ;;  %s2131_s22 = scalar_lea.vmem %s2130_s13, 4096 }
  0x68   : > { %771 = vmatprep.subr.bf16.mxu0 %v1923_v5  ;;  %720 = vperm.xlu0 %1915, %v717_v10   ;;  %v538_v18 = vld [vmem:[%s3380_s6 + $0x20] sm:$0xff]  ;;  %p2132_p7 = scmp.lt.s32.totalorder %s3322_s21, %s2130_s13  ;;  %p2133_p10 = scmp.lt.s32.totalorder %s2131_s22, %s2125_s7 }
  0x69   : > { %p2127_p12 = pnand %p2126_p0, %p3601_p3 }
  0x6a   : > { %481 = vmatpush1.bf16.msra.mxu1 %v1925_v6  ;;  %p2134_p9 = por %p2133_p10, %p2132_p7 }
  0x6b   : > { %772 = vmatpush1.bf16.msra.mxu0 %v1925_v6  ;;  %482 = vmatprep.subr.bf16.mxu1 %v1926_v7  ;;  %p2128_p13 = pneg %p2127_p12 }
  0x6c   : > { %773 = vmatprep.subr.bf16.mxu0 %v1926_v7  ;;  %544 = vperm.xlu0 %1915, %v534_v13  }
  0x6d   : > { %p2135_p11 = pnand %p2134_p9, %p2128_p13 }
  0x6e   : > { %483 = vmatpush1.bf16.msra.mxu1 %v1928_v9 }
  0x6f   : > { %774 = vmatpush1.bf16.msra.mxu0 %v1928_v9  ;;  %614 = vmatprep.subr.bf16.mxu1 %v1917_v1 }
  0x70   : > { %549 = vperm.xlu0 %1915, %v535_v14  }
  0x71   : > { %1794 = vmatmul.mubr.msk.bf16.vlgmr.msra.gmra.mrb[0].mxu1 %vm472_vm0, %v425_v11 }
  0x72   : > { %1812 = vmatmul.mubr.msk.bf16.vlgmr.msra.gmra.mrb[0].mxu0 %vm472_vm0, %v716_v12  ;;  %615 = vmatpush1.bf16.msra.mxu1 %v1919_v2 }
  0x73   : > { %646 = vmatprep.mubr.bf16.mxu1 %v2217_v0  ;;  %616 = vmatprep.subr.bf16.mxu1 %v1920_v3 }
  0x74   : > { %938 = vmatprep.mubr.bf16.mxu0 %v2217_v0  ;;  %554 = vperm.xlu0 %1915, %v536_v15  }
  0x76   : > { %617 = vmatpush1.bf16.msra.mxu1 %v1922_v4 }
  0x77   : > { %618 = vmatprep.subr.bf16.mxu1 %v1923_v5 }
  0x78   : > { %559 = vperm.xlu0 %1915, %v537_v17  }
  0x7a   : > { %619 = vmatpush1.bf16.msra.mxu1 %v1925_v6 }
  0x7b   : > { %620 = vmatprep.subr.bf16.mxu1 %v1926_v7 }
  0x7c   : > { %564 = vperm.xlu0 %1915, %v538_v18  }
  0x7e   : > { %621 = vmatpush1.bf16.msra.mxu1 %v1928_v9 }
  0x80   : > { %569 = vperm.xlu0 %1915, %v539_v20   ;;  %v541_v20 = vld [vmem:[%s3380_s6 + $0x38] sm:$0xff] }
  0x81   : > { %1800 = vmatmul.mubr.msk.bf16.vlgmr.msra.gmra.mrb[4].mxu1 %vm472_vm0, %v1929_v16 }
  0x82   : > { %656 = vmatprep.mubr.bf16.mxu1 %v2217_v0 }
  0x84   : > { %574 = vperm.xlu0 %1915, %v540_v21  }
  0x89   : > { %1801 = vmatmul.mubr.msk.bf16.gmra.mrb[8].mxu1 %vm472_vm0, %v1930_v19 }
  0x8a   : > { %666 = vmatprep.mubr.bf16.mxu1 %v2217_v0 }
  0x91   : > { %1802 = vmatmul.mubr.msk.bf16.gmra.mrb[12].mxu1 %vm472_vm0, %v1931_v22 }
  0x92   : > { %676 = vmatprep.mubr.bf16.mxu1 %v2217_v0 }
  0x99   : > { %1803 = vmatmul.mubr.msk.bf16.gmra.mrb[16].mxu1 %vm472_vm0, %v1932_v23 }
  0xe3   : > { %v430_v24 = vpop.permute.xlu0 %429 }
  0xe7   : > { %v721_v25 = vpop.permute.xlu0 %720 }
  0xeb   : > { %v545_v39 = vpop.permute.xlu0 %544 }
  0xef   : > { %v550_v42 = vpop.permute.xlu0 %549 }
  0xf3   : > { %v555_v43 = vpop.permute.xlu0 %554 }
  0xf7   : > { %v560_v53 = vpop.permute.xlu0 %559 }
  0xfb   : > { %v565_v61 = vpop.permute.xlu0 %564 }
  0xff   : > { %v570_v7 = vpop.permute.xlu0 %569 }
 0x144   : > { %v510_v27 = vpop.f32.mrb[0].mxu1 }
 0x145   : > { %v801_v26 = vpop.f32.mrb[0].mxu0  ;;  %v512_v29 = vpop.f32.mrb[1].mxu1  ;;  %v511_v31 = vadd.f32 %v510_v27, %v430_v24 }
 0x146   : > { %v802_v28 = vadd.f32 %v801_v26, %v721_v25  ;;  %v803_v30 = vpop.f32.mrb[1].mxu0  ;;  %v514_v33 = vpop.f32.mrb[2].mxu1  ;;  %v513_v62 = vadd.f32 %v512_v29, %v430_v24 }
 0x147   : > { %v804_v32 = vadd.f32 %v803_v30, %v721_v25  ;;  %v805_v34 = vpop.f32.mrb[2].mxu0  ;;  %v515_v36 = vpop.f32.mrb[3].mxu1  ;;  %v1841_v37 = vpack.c.bf16 %v511_v31, %v511_v31 }
 0x148   : > { %v808_v35 = vpack.c.bf16 %v802_v28, %v802_v28  ;;  %v806_v38 = vpop.f32.mrb[3].mxu0  ;;  %v1842_v4 = vpack.c.bf16 %v513_v62, %v513_v62 }
 0x149   : > { %v809_v40 = vpack.c.bf16 %v804_v32, %v804_v32  ;;  %818 = vxpose.xlu1.c.b16.start.end [1/1] (short) %v1841_v37, 128  ;;  %v575_v37 = vpop.permute.xlu0 %574 }
 0x14a   : > { %v901_v41 = vsel %vm899_vm1, %v808_v35, 0 }
 0x14b   : > { %1815 = vmatprep.subr.msk.bf16.mxu0 %vm899_vm1, %v809_v40 }
 0x14c   : > { %907 = vmatpush1.bf16.msra.mxu0 %v901_v41 }
 0x154   : > { %v648_v44 = vpop.f32.mrb[4].mxu1 }
 0x155   : > { %v650_v45 = vpop.f32.mrb[5].mxu1  ;;  %v2526_v47 = vadd.f32 %v648_v44, %v545_v39 }
 0x156   : > { %v652_v46 = vpop.f32.mrb[6].mxu1  ;;  %v651_v50 = vadd.f32 %v650_v45, %v545_v39 }
 0x157   : > { %3464 = vst [vmem:[#allocation17_spill] sm:$0xff] %v2526_v47  ;;  %v2528_v48 = vadd.f32 %v652_v46, %v550_v42  ;;  %v654_v49 = vpop.f32.mrb[7].mxu1 }
 0x158   : > { %v655_v51 = vadd.f32 %v654_v49, %v550_v42 }
 0x159   : > { %3465 = vst [vmem:[#allocation18_spill] sm:$0xff] %v2528_v48 }
 0x15a   : > { %v688_v54 = vpack.c.bf16 %v655_v51, %v651_v50 }
 0x15c   : > { %v658_v55 = vpop.f32.mrb[8].mxu1  ;;  %1511 = vmatprep.mubr.bf16.mxu1 %v688_v54 }
 0x15d   : > { %v660_v56 = vpop.f32.mrb[9].mxu1  ;;  %v2532_v58 = vadd.f32 %v658_v55, %v555_v43 }
 0x15e   : > { %v662_v57 = vpop.f32.mrb[10].mxu1  ;;  %v2536_v63 = vadd.f32 %v660_v56, %v555_v43 }
 0x15f   : > { %3466 = vst [vmem:[#allocation19_spill] sm:$0xff] %v2532_v58  ;;  %v2534_v59 = vadd.f32 %v662_v57, %v560_v53  ;;  %v664_v60 = vpop.f32.mrb[11].mxu1 }
 0x160   : > { %3468 = vst [vmem:[#allocation21_spill] sm:$0xff] %v2536_v63  ;;  %v2538_v1 = vadd.f32 %v664_v60, %v560_v53 }
 0x161   : > { %3467 = vst [vmem:[#allocation20_spill] sm:$0xff] %v2534_v59 }
 0x162   : > { %3469 = vst [vmem:[#allocation22_spill] sm:$0xff] %v2538_v1 }
 0x164   : > { %v668_v5 = vpop.f32.mrb[12].mxu1 }
 0x165   : > { %v670_v6 = vpop.f32.mrb[13].mxu1  ;;  %v2544_v9 = vadd.f32 %v668_v5, %v565_v61 }
 0x166   : > { %v672_v8 = vpop.f32.mrb[14].mxu1  ;;  %834 = vxpose.xlu1.c.b16.start.end [1/1] (short) %v1842_v4, 128  ;;  %v2548_v12 = vadd.f32 %v670_v6, %v565_v61 }
 0x167   : > { %3470 = vst [vmem:[#allocation23_spill] sm:$0xff] %v2544_v9  ;;  %v2546_v10 = vadd.f32 %v672_v8, %v570_v7  ;;  %v674_v11 = vpop.f32.mrb[15].mxu1 }
 0x168   : > { %3472 = vst [vmem:[#allocation25_spill] sm:$0xff] %v2548_v12  ;;  %v2550_v13 = vadd.f32 %v674_v11, %v570_v7 }
 0x169   : > { %3471 = vst [vmem:[#allocation24_spill] sm:$0xff] %v2546_v10 }
 0x16a   : > { %3473 = vst [vmem:[#allocation26_spill] sm:$0xff] %v2550_v13  ;;  %1916 = vset.pattern.permute.xlu1 %v2217_v0 }
 0x16c   : > { %v678_v16 = vpop.f32.mrb[16].mxu1 }
 0x16d   : > { %v680_v17 = vpop.f32.mrb[17].mxu1  ;;  %v2582_v39 = vadd.f32 %v678_v16, %v575_v37 }
 0x16e   : > { %v682_v18 = vpop.f32.mrb[18].mxu1  ;;  %v2584_v40 = vadd.f32 %v680_v17, %v575_v37 }
 0x16f   : > { %v684_v19 = vpop.f32.mrb[19].mxu1  ;;  %3474 = vst [vmem:[#allocation27_spill] sm:$0xff] %v2582_v39 }
 0x170   : > { %3475 = vst [vmem:[#allocation28_spill] sm:$0xff] %v2584_v40 }
 0x186   : > { %579 = vperm.xlu1 %1916, %v541_v20  }
 0x1af   : > { %v826_v21 = vpop.trf.xlu1 }
 0x1b0   : > { %1816 = vmatmul.mubr.msk.bf16.vlgmr.msra.gmra.mrb[4].mxu0 %vm850_vm2, %v826_v21 }
 0x1b1   : > { %948 = vmatprep.mubr.bf16.mxu0 %v2217_v0 }
 0x1b3   : > { %v827_v22 = vpop.trf.xlu1 }
 0x1b7   : > { %v828_v23 = vpop.trf.xlu1 }
 0x1b8   : > { %1817 = vmatmul.mubr.msk.bf16.gmra.mrb[8].mxu0 %vm850_vm2, %v827_v22 }
 0x1b9   : > { %958 = vmatprep.mubr.bf16.mxu0 %v2217_v0 }
 0x1bb   : > { %v829_v24 = vpop.trf.xlu1 }
 0x1bf   : > { %v830_v25 = vpop.trf.xlu1 }
 0x1c0   : > { %1818 = vmatmul.mubr.msk.bf16.gmra.mrb[12].mxu0 %vm850_vm2, %v828_v23 }
 0x1c1   : > { %968 = vmatprep.mubr.bf16.mxu0 %v2217_v0 }
 0x1c3   : > { %v831_v26 = vpop.trf.xlu1 }
 0x1c7   : > { %v832_v27 = vpop.trf.xlu1 }
 0x1c8   : > { %1819 = vmatmul.mubr.msk.bf16.gmra.mrb[16].mxu0 %vm850_vm2, %v829_v24 }
 0x1c9   : > { %978 = vmatprep.mubr.bf16.mxu0 %v2217_v0 }
 0x1cb   : > { %v833_v28 = vpop.trf.xlu1 }
 0x1cf   : > { %v842_v29 = vpop.trf.xlu1 }
 0x1d0   : > { %1820 = vmatmul.mubr.msk.bf16.gmra.mrb[20].mxu0 %vm850_vm2, %v830_v25 }
 0x1d1   : > { %988 = vmatprep.mubr.bf16.mxu0 %v2217_v0 }
 0x1d3   : > { %v843_v30 = vpop.trf.xlu1 }
 0x1d7   : > { %v844_v31 = vpop.trf.xlu1 }
 0x1d8   : > { %1821 = vmatmul.mubr.msk.bf16.gmra.mrb[24].mxu0 %vm850_vm2, %v831_v26 }
 0x1d9   : > { %998 = vmatprep.mubr.bf16.mxu0 %v2217_v0 }
 0x1db   : > { %v845_v32 = vpop.trf.xlu1 }
 0x1df   : > { %v846_v33 = vpop.trf.xlu1 }
 0x1e0   : > { %1822 = vmatmul.mubr.msk.bf16.gmra.mrb[28].mxu0 %vm850_vm2, %v832_v27 }
 0x1e1   : > { %1008 = vmatprep.mubr.bf16.mxu0 %v2217_v0 }
 0x1e3   : > { %v847_v34 = vpop.trf.xlu1 }
 0x1e7   : > { %v848_v35 = vpop.trf.xlu1 }
 0x1e8   : > { %1823 = vmatmul.mubr.msk.bf16.gmra.mrb[32].mxu0 %vm850_vm2, %v833_v28 }
 0x1e9   : > { %1018 = vmatprep.mubr.bf16.mxu0 %v2217_v0 }
 0x1eb   : > { %v849_v36 = vpop.trf.xlu1 }
 0x1f0   : > { %1824 = vmatmul.mubr.msk.bf16.gmra.mrb[36].mxu0 %vm850_vm2, %v842_v29 }
 0x1f1   : > { %1028 = vmatprep.mubr.bf16.mxu0 %v2217_v0 }
 0x1f8   : > { %1825 = vmatmul.mubr.msk.bf16.gmra.mrb[40].mxu0 %vm850_vm2, %v843_v30 }
 0x1f9   : > { %1038 = vmatprep.mubr.bf16.mxu0 %v2217_v0 }
 0x200   : > { %1826 = vmatmul.mubr.msk.bf16.gmra.mrb[44].mxu0 %vm850_vm2, %v844_v31 }
 0x201   : > { %1048 = vmatprep.mubr.bf16.mxu0 %v2217_v0 }
 0x205   : > { %v580_v38 = vpop.permute.xlu1 %579 }
 0x206   : > { %v2586_v41 = vadd.f32 %v682_v18, %v580_v38  ;;  %v2588_v42 = vadd.f32 %v684_v19, %v580_v38 }
 0x208   : > { %3476 = vst [vmem:[#allocation29_spill] sm:$0xff] %v2586_v41  ;;  %3477 = vst [vmem:[#allocation30_spill] sm:$0xff] %v2588_v42  ;;  %1827 = vmatmul.mubr.msk.bf16.gmra.mrb[48].mxu0 %vm850_vm2, %v845_v32 }
 0x209   : > { %1058 = vmatprep.mubr.bf16.mxu0 %v2217_v0 }
 0x210   : > { %1828 = vmatmul.mubr.msk.bf16.gmra.mrb[52].mxu0 %vm850_vm2, %v846_v33 }
 0x211   : > { %1068 = vmatprep.mubr.bf16.mxu0 %v2217_v0 }
 0x218   : > { %1829 = vmatmul.mubr.msk.bf16.gmra.mrb[56].mxu0 %vm850_vm2, %v847_v34 }
 0x219   : > { %1078 = vmatprep.mubr.bf16.mxu0 %v2217_v0 }
 0x220   : > { %1830 = vmatmul.mubr.msk.bf16.gmra.mrb[60].mxu0 %vm850_vm2, %v848_v35 }
 0x221   : > { %1088 = vmatprep.mubr.bf16.mxu0 %v2217_v0 }
 0x228   : > { %1831 = vmatmul.mubr.msk.bf16.gmra.mrb[64].mxu0 %vm850_vm2, %v849_v36 }
 0x283   : > { %v2603_v45 = vpop.f32.mrb[4].mxu0 }
 0x284   : > { %v2605_v46 = vpop.f32.mrb[5].mxu0 }
 0x285   : > { %v2607_v49 = vpop.f32.mrb[6].mxu0 }
 0x286   : > { %v2609_v50 = vpop.f32.mrb[7].mxu0 }
 0x28b   : > { %v2611_v51 = vpop.f32.mrb[8].mxu0 }
 0x28c   : > { %v1099_v53 = vmax.f32 %v2603_v45, %v2611_v51  ;;  %v2615_v54 = vpop.f32.mrb[9].mxu0 }
 0x28d   : > { %v1136_v0 = vmax.f32 %v2605_v46, %v2615_v54  ;;  %v2619_v55 = vpop.f32.mrb[10].mxu0 }
 0x28e   : > { %v1100_v56 = vmax.f32 %v2607_v49, %v2619_v55  ;;  %v2623_v57 = vpop.f32.mrb[11].mxu0 }
 0x28f   : > { %v1137_v60 = vmax.f32 %v2609_v50, %v2623_v57 }
 0x293   : > { %v2627_v61 = vpop.f32.mrb[12].mxu0 }
 0x294   : > { %v1101_v62 = vmax.f32 %v1099_v53, %v2627_v61  ;;  %v2630_v4 = vpop.f32.mrb[13].mxu0 }
 0x295   : > { %v1138_v5 = vmax.f32 %v1136_v0, %v2630_v4  ;;  %v2633_v6 = vpop.f32.mrb[14].mxu0 }
 0x296   : > { %v1102_v7 = vmax.f32 %v1100_v56, %v2633_v6  ;;  %v2636_v8 = vpop.f32.mrb[15].mxu0 }
 0x297   : > { %v1139_v11 = vmax.f32 %v1137_v60, %v2636_v8 }
 0x29b   : > { %v2639_v16 = vpop.f32.mrb[16].mxu0 }
 0x29c   : > { %v1103_v17 = vmax.f32 %v1101_v62, %v2639_v16  ;;  %v2642_v18 = vpop.f32.mrb[17].mxu0 }
 0x29d   : > { %v1140_v19 = vmax.f32 %v1138_v5, %v2642_v18  ;;  %v2645_v20 = vpop.f32.mrb[18].mxu0 }
 0x29e   : > { %v1104_v21 = vmax.f32 %v1102_v7, %v2645_v20  ;;  %v2648_v22 = vpop.f32.mrb[19].mxu0 }
 0x29f   : > { %v1141_v23 = vmax.f32 %v1139_v11, %v2648_v22 }
 0x2a3   : > { %v2651_v24 = vpop.f32.mrb[20].mxu0 }
 0x2a4   : > { %v1105_v25 = vmax.f32 %v1103_v17, %v2651_v24  ;;  %v2654_v26 = vpop.f32.mrb[21].mxu0 }
 0x2a5   : > { %v1142_v27 = vmax.f32 %v1140_v19, %v2654_v26  ;;  %v2657_v28 = vpop.f32.mrb[22].mxu0 }
 0x2a6   : > { %v1106_v29 = vmax.f32 %v1104_v21, %v2657_v28  ;;  %v2660_v30 = vpop.f32.mrb[23].mxu0 }
 0x2a7   : > { %v1143_v31 = vmax.f32 %v1141_v23, %v2660_v30 }
 0x2ab   : > { %v2663_v32 = vpop.f32.mrb[24].mxu0 }
 0x2ac   : > { %v1107_v33 = vmax.f32 %v1105_v25, %v2663_v32  ;;  %v2666_v34 = vpop.f32.mrb[25].mxu0 }
 0x2ad   : > { %v1144_v35 = vmax.f32 %v1142_v27, %v2666_v34  ;;  %v2669_v36 = vpop.f32.mrb[26].mxu0 }
 0x2ae   : > { %v1108_v37 = vmax.f32 %v1106_v29, %v2669_v36  ;;  %v2672_v38 = vpop.f32.mrb[27].mxu0 }
 0x2af   : > { %3478 = vst [vmem:[#allocation31_spill] sm:$0xff] %v2672_v38  ;;  %v1145_v53 = vmax.f32 %v1143_v31, %v2672_v38 }
 0x2b3   : > { %v2675_v0 = vpop.f32.mrb[28].mxu0 }
 0x2b4   : > { %v1109_v56 = vmax.f32 %v1107_v33, %v2675_v0  ;;  %v2678_v60 = vpop.f32.mrb[29].mxu0 }
 0x2b5   : > { %3479 = vst [vmem:[#allocation32_spill] sm:$0xff] %v2678_v60  ;;  %v1146_v62 = vmax.f32 %v1144_v35, %v2678_v60  ;;  %v2681_v5 = vpop.f32.mrb[30].mxu0 }
 0x2b6   : > { %v1110_v7 = vmax.f32 %v1108_v37, %v2681_v5  ;;  %v2684_v11 = vpop.f32.mrb[31].mxu0 }
 0x2b7   : > { %3480 = vst [vmem:[#allocation33_spill] sm:$0xff] %v2684_v11  ;;  %v1147_v17 = vmax.f32 %v1145_v53, %v2684_v11 }
 0x2bb   : > { %v2687_v19 = vpop.f32.mrb[32].mxu0 }
 0x2bc   : > { %v1111_v21 = vmax.f32 %v1109_v56, %v2687_v19  ;;  %v2690_v23 = vpop.f32.mrb[33].mxu0 }
 0x2bd   : > { %3481 = vst [vmem:[#allocation34_spill] sm:$0xff] %v2690_v23  ;;  %v1148_v25 = vmax.f32 %v1146_v62, %v2690_v23  ;;  %v2693_v27 = vpop.f32.mrb[34].mxu0 }
 0x2be   : > { %v1112_v29 = vmax.f32 %v1110_v7, %v2693_v27  ;;  %v2696_v31 = vpop.f32.mrb[35].mxu0 }
 0x2bf   : > { %3482 = vst [vmem:[#allocation35_spill] sm:$0xff] %v2696_v31  ;;  %v1149_v33 = vmax.f32 %v1147_v17, %v2696_v31 }
 0x2c3   : > { %v2699_v35 = vpop.f32.mrb[36].mxu0 }
 0x2c4   : > { %v1113_v37 = vmax.f32 %v1111_v21, %v2699_v35  ;;  %v2702_v53 = vpop.f32.mrb[37].mxu0 }
 0x2c5   : > { %3483 = vst [vmem:[#allocation36_spill] sm:$0xff] %v2702_v53  ;;  %v1150_v56 = vmax.f32 %v1148_v25, %v2702_v53  ;;  %v2705_v43 = vpop.f32.mrb[38].mxu0 }
 0x2c6   : > { %v1114_v62 = vmax.f32 %v1112_v29, %v2705_v43  ;;  %v2708_v44 = vpop.f32.mrb[39].mxu0 }
 0x2c7   : > { %3484 = vst [vmem:[#allocation37_spill] sm:$0xff] %v2708_v44  ;;  %v1151_v7 = vmax.f32 %v1149_v33, %v2708_v44 }
 0x2cb   : > { %v2711_v14 = vpop.f32.mrb[40].mxu0 }
 0x2cc   : > { %v1115_v17 = vmax.f32 %v1113_v37, %v2711_v14  ;;  %v2714_v15 = vpop.f32.mrb[41].mxu0 }
 0x2cd   : > { %3485 = vst [vmem:[#allocation38_spill] sm:$0xff] %v2714_v15  ;;  %v1152_v21 = vmax.f32 %v1150_v56, %v2714_v15  ;;  %v2717_v2 = vpop.f32.mrb[42].mxu0 }
 0x2ce   : > { %v1116_v25 = vmax.f32 %v1114_v62, %v2717_v2  ;;  %v2720_v3 = vpop.f32.mrb[43].mxu0 }
 0x2cf   : > { %3486 = vst [vmem:[#allocation39_spill] sm:$0xff] %v2720_v3  ;;  %v1153_v29 = vmax.f32 %v1151_v7, %v2720_v3 }
 0x2d3   : > { %v2723_v52 = vpop.f32.mrb[44].mxu0 }
 0x2d4   : > { %v1117_v33 = vmax.f32 %v1115_v17, %v2723_v52  ;;  %v2726_v39 = vpop.f32.mrb[45].mxu0 }
 0x2d5   : > { %3487 = vst [vmem:[#allocation40_spill] sm:$0xff] %v2726_v39  ;;  %v1154_v37 = vmax.f32 %v1152_v21, %v2726_v39  ;;  %v2729_v41 = vpop.f32.mrb[46].mxu0 }
 0x2d6   : > { %v1118_v56 = vmax.f32 %v1116_v25, %v2729_v41  ;;  %v2732_v40 = vpop.f32.mrb[47].mxu0 }
 0x2d7   : > { %3488 = vst [vmem:[#allocation41_spill] sm:$0xff] %v2732_v40  ;;  %v1155_v62 = vmax.f32 %v1153_v29, %v2732_v40 }
 0x2db   : > { %v2735_v42 = vpop.f32.mrb[48].mxu0 }
 0x2dc   : > { %v1119_v7 = vmax.f32 %v1117_v33, %v2735_v42  ;;  %v2738_v9 = vpop.f32.mrb[49].mxu0 }
 0x2dd   : > { %3489 = vst [vmem:[#allocation42_spill] sm:$0xff] %v2738_v9  ;;  %v1156_v17 = vmax.f32 %v1154_v37, %v2738_v9  ;;  %v2741_v10 = vpop.f32.mrb[50].mxu0 }
 0x2de   : > { %v1120_v21 = vmax.f32 %v1118_v56, %v2741_v10  ;;  %v2744_v12 = vpop.f32.mrb[51].mxu0 }
 0x2df   : > { %3490 = vst [vmem:[#allocation43_spill] sm:$0xff] %v2744_v12  ;;  %v1157_v25 = vmax.f32 %v1155_v62, %v2744_v12 }
 0x2e3   : > { %v2747_v13 = vpop.f32.mrb[52].mxu0 }
 0x2e4   : > { %v1121_v29 = vmax.f32 %v1119_v7, %v2747_v13  ;;  %v2750_v58 = vpop.f32.mrb[53].mxu0 }
 0x2e5   : > { %3491 = vst [vmem:[#allocation44_spill] sm:$0xff] %v2750_v58  ;;  %v1158_v33 = vmax.f32 %v1156_v17, %v2750_v58  ;;  %v2753_v59 = vpop.f32.mrb[54].mxu0 }
 0x2e6   : > { %v1122_v37 = vmax.f32 %v1120_v21, %v2753_v59  ;;  %v2756_v63 = vpop.f32.mrb[55].mxu0 }
 0x2e7   : > { %3492 = vst [vmem:[#allocation45_spill] sm:$0xff] %v2756_v63  ;;  %v1159_v56 = vmax.f32 %v1157_v25, %v2756_v63 }
 0x2eb   : > { %v2759_v1 = vpop.f32.mrb[56].mxu0 }
 0x2ec   : > { %v1123_v62 = vmax.f32 %v1121_v29, %v2759_v1  ;;  %v2762_v47 = vpop.f32.mrb[57].mxu0 }
 0x2ed   : > { %3493 = vst [vmem:[#allocation46_spill] sm:$0xff] %v2762_v47  ;;  %v1160_v7 = vmax.f32 %v1158_v33, %v2762_v47  ;;  %v2765_v48 = vpop.f32.mrb[58].mxu0 }
 0x2ee   : > { %v1124_v17 = vmax.f32 %v1122_v37, %v2765_v48  ;;  %v2768_v58 = vpop.f32.mrb[59].mxu0 }
 0x2ef   : > { %3494 = vst [vmem:[#allocation47_spill] sm:$0xff] %v2768_v58  ;;  %v1161_v21 = vmax.f32 %v1159_v56, %v2768_v58 }
 0x2f3   : > { %v2771_v12 = vpop.f32.mrb[60].mxu0 }
 0x2f4   : > { %v1125_v25 = vmax.f32 %v1123_v62, %v2771_v12  ;;  %v2774_v63 = vpop.f32.mrb[61].mxu0 }
 0x2f5   : > { %3495 = vst [vmem:[#allocation48_spill] sm:$0xff] %v2774_v63  ;;  %v1162_v29 = vmax.f32 %v1160_v7, %v2774_v63  ;;  %v2777_v9 = vpop.f32.mrb[62].mxu0 }
 0x2f6   : > { %v1126_v33 = vmax.f32 %v1124_v17, %v2777_v9  ;;  %v2780_v47 = vpop.f32.mrb[63].mxu0 }
 0x2f7   : > { %3496 = vst [vmem:[#allocation49_spill] sm:$0xff] %v2780_v47  ;;  %v1163_v37 = vmax.f32 %v1161_v21, %v2780_v47 }
 0x2fb   : > { %v2783_v40 = vpop.f32.mrb[64].mxu0 }
 0x2fc   : > { %v1127_v56 = vmax.f32 %v1125_v25, %v2783_v40  ;;  %v2786_v58 = vpop.f32.mrb[65].mxu0 }
 0x2fd   : > { %3497 = vst [vmem:[#allocation50_spill] sm:$0xff] %v2786_v58  ;;  %v1164_v62 = vmax.f32 %v1162_v29, %v2786_v58  ;;  %v2789_v39 = vpop.f32.mrb[66].mxu0 }
 0x2fe   : > { %v1128_v7 = vmax.f32 %v1126_v33, %v2789_v39  ;;  %v2792_v63 = vpop.f32.mrb[67].mxu0 }
 0x2ff   : > { %3498 = vst [vmem:[#allocation51_spill] sm:$0xff] %v2792_v63  ;;  %v1165_v17 = vmax.f32 %v1163_v37, %v2792_v63 }
 0x300   : > { %v1129_v3 = vmax.f32 %v1127_v56, %v1128_v7 }
 0x301   : > { %v1166_v15 = vmax.f32 %v1164_v62, %v1165_v17 }
 0x302   : > { %v1130_v44 = vrot.slane %v1129_v3, 4 }
 0x303   : > { %v1167_v21 = vrot.slane %v1166_v15, 4 }
 0x304   : > { %v1131_v47 = vmax.f32 %v1129_v3, %v1130_v44 }
 0x305   : > { %v1168_v53 = vmax.f32 %v1166_v15, %v1167_v21 }
 0x306   : > { %v1132_v31 = vrot.slane %v1131_v47, 2 }
 0x307   : > { %v1169_v25 = vrot.slane %v1168_v53, 2 }
 0x308   : > { %v1133_v23 = vmax.f32 %v1131_v47, %v1132_v31 }
 0x309   : > { %v1170_v11 = vmax.f32 %v1168_v53, %v1169_v25 }
 0x30a   : > { %v1134_v60 = vrot.slane %v1133_v23, 1 }
 0x30b   : > { %v1171_v29 = vrot.slane %v1170_v11, 1 }
 0x30c   : > { %v2795_v58 = vmax.f32 %v1133_v23, %v1134_v60 }
 0x30d   : > { %v2797_v38 = vmax.f32 %v1170_v11, %v1171_v29 }
 0x30e   : > { %v1173_v33 = vsub.f32 %v2603_v45, %v2795_v58  ;;  %v1175_v37 = vsub.f32 %v2607_v49, %v2795_v58  ;;  %v1177_v3 = vsub.f32 %v2611_v51, %v2795_v58  ;;  %v1179_v15 = vsub.f32 %v2619_v55, %v2795_v58 }
 0x30f   : > { %v1181_v47 = vsub.f32 %v2627_v61, %v2795_v58  ;;  %v1183_v44 = vsub.f32 %v2633_v6, %v2795_v58  ;;  %v1185_v60 = vsub.f32 %v2639_v16, %v2795_v58  ;;  %v1187_v45 = vsub.f32 %v2645_v20, %v2795_v58 }
 0x310   : > { %v1189_v49 = vsub.f32 %v2651_v24, %v2795_v58  ;;  %v1191_v51 = vsub.f32 %v2657_v28, %v2795_v58  ;;  %v1193_v55 = vsub.f32 %v2663_v32, %v2795_v58  ;;  %v1195_v61 = vsub.f32 %v2669_v36, %v2795_v58 }
 0x311   : > { %v1197_v6 = vsub.f32 %v2675_v0, %v2795_v58  ;;  %v1199_v16 = vsub.f32 %v2681_v5, %v2795_v58  ;;  %v1201_v20 = vsub.f32 %v2687_v19, %v2795_v58  ;;  %v1203_v24 = vsub.f32 %v2693_v27, %v2795_v58 }
 0x312   : > { %v1205_v28 = vsub.f32 %v2699_v35, %v2795_v58  ;;  %v1207_v32 = vsub.f32 %v2705_v43, %v2795_v58  ;;  %v1209_v36 = vsub.f32 %v2711_v14, %v2795_v58  ;;  %v1211_v0 = vsub.f32 %v2717_v2, %v2795_v58  ;;  %v3518_v43 = vld [vmem:[#allocation50_spill] sm:$0xff] }
 0x313   : > { %v1213_v5 = vsub.f32 %v2723_v52, %v2795_v58  ;;  %v1215_v11 = vsub.f32 %v2729_v41, %v2795_v58  ;;  %v1217_v19 = vsub.f32 %v2735_v42, %v2795_v58  ;;  %v1219_v23 = vsub.f32 %v2741_v10, %v2795_v58 }
 0x314   : > { %v1237_v31 = vmul.f32 1.442695, %v1173_v33  ;;  %v1241_v35 = vmul.f32 1.442695, %v1175_v37  ;;  %v1245_v53 = vmul.f32 1.442695, %v1177_v3 }
 0x315   : > { %v1249_v62 = vmul.f32 1.442695, %v1179_v15  ;;  %v1253_v17 = vmul.f32 1.442695, %v1181_v47  ;;  %v1257_v21 = vmul.f32 1.442695, %v1183_v44 }
 0x316   : > { %1933 = vpow2.f32 %v1237_v31  ;;  %v1261_v25 = vmul.f32 1.442695, %v1185_v60  ;;  %v1265_v29 = vmul.f32 1.442695, %v1187_v45  ;;  %v1269_v10 = vmul.f32 1.442695, %v1189_v49 }
 0x317   : > { %1935 = vpow2.f32 %v1241_v35  ;;  %v1273_v27 = vmul.f32 1.442695, %v1191_v51  ;;  %v1277_v33 = vmul.f32 1.442695, %v1193_v55  ;;  %v1281_v37 = vmul.f32 1.442695, %v1195_v61 }
 0x318   : > { %1937 = vpow2.f32 %v1245_v53  ;;  %v1285_v3 = vmul.f32 1.442695, %v1197_v6  ;;  %v1289_v56 = vmul.f32 1.442695, %v1199_v16  ;;  %v1293_v15 = vmul.f32 1.442695, %v1201_v20 }
 0x319   : > { %1939 = vpow2.f32 %v1249_v62  ;;  %v1297_v42 = vmul.f32 1.442695, %v1203_v24  ;;  %v1301_v7 = vmul.f32 1.442695, %v1205_v28  ;;  %v1305_v31 = vmul.f32 1.442695, %v1207_v32 }
 0x31a   : > { %1941 = vpow2.f32 %v1253_v17  ;;  %v1309_v47 = vmul.f32 1.442695, %v1209_v36  ;;  %v1313_v44 = vmul.f32 1.442695, %v1211_v0  ;;  %v1317_v35 = vmul.f32 1.442695, %v1213_v5 }
 0x31b   : > { %1943 = vpow2.f32 %v1257_v21  ;;  %v2867_v60 = vmul.f32 1.442695, %v1215_v11  ;;  %v2869_v45 = vmul.f32 1.442695, %v1217_v19  ;;  %v2871_v49 = vmul.f32 1.442695, %v1219_v23 }
 0x31c   : > { %1945 = vpow2.f32 %v1261_v25  ;;  %v3499_v5 = vld [vmem:[#allocation31_spill] sm:$0xff]  ;;  %v3501_v53 = vld [vmem:[#allocation33_spill] sm:$0xff]  ;;  %v3502_v21 = vld [vmem:[#allocation34_spill] sm:$0xff] }
 0x31d   : > { %1947 = vpow2.f32 %v1265_v29  ;;  %v3503_v29 = vld [vmem:[#allocation35_spill] sm:$0xff]  ;;  %v3505_v0 = vld [vmem:[#allocation37_spill] sm:$0xff]  ;;  %v3506_v36 = vld [vmem:[#allocation38_spill] sm:$0xff] }
 0x31e   : > { %1949 = vpow2.f32 %v1269_v10  ;;  %v3500_v10 = vld [vmem:[#allocation32_spill] sm:$0xff]  ;;  %v3507_v25 = vld [vmem:[#allocation39_spill] sm:$0xff]  ;;  %v3509_v20 = vld [vmem:[#allocation41_spill] sm:$0xff] }
 0x31f   : > { %1951 = vpow2.f32 %v1273_v27  ;;  %v3508_v24 = vld [vmem:[#allocation40_spill] sm:$0xff]  ;;  %v3510_v62 = vld [vmem:[#allocation42_spill] sm:$0xff]  ;;  %v3511_v61 = vld [vmem:[#allocation43_spill] sm:$0xff] }
 0x320   : > { %v2881_v16 = vpop.eup %1933  ;;  %1953 = vpow2.f32 %v1277_v33  ;;  %v3512_v33 = vld [vmem:[#allocation44_spill] sm:$0xff]  ;;  %v3513_v51 = vld [vmem:[#allocation45_spill] sm:$0xff] }
 0x321   : > { %v2889_v32 = vpop.eup %1935  ;;  %1955 = vpow2.f32 %v1281_v37  ;;  %v3504_v37 = vld [vmem:[#allocation36_spill] sm:$0xff] }
 0x322   : > { %v2897_v19 = vpop.eup %1937  ;;  %1957 = vpow2.f32 %v1285_v3  ;;  %v1365_v23 = vadd.f32 %v2889_v32, %v2881_v16  ;;  %v3517_v3 = vld [vmem:[#allocation49_spill] sm:$0xff] }
 0x323   : > { %v2905_v17 = vpop.eup %1939  ;;  %1959 = vpow2.f32 %v1289_v56  ;;  %v3515_v56 = vld [vmem:[#allocation47_spill] sm:$0xff] }
 0x324   : > { %v2913_v11 = vpop.eup %1941  ;;  %1961 = vpow2.f32 %v1293_v15  ;;  %v1366_v27 = vadd.f32 %v2897_v19, %v1365_v23 }
 0x325   : > { %v2920_v28 = vpop.eup %1943  ;;  %1963 = vpow2.f32 %v1297_v42 }
 0x326   : > { %v2928_v6 = vpop.eup %1945  ;;  %1965 = vpow2.f32 %v1301_v7  ;;  %v1367_v23 = vadd.f32 %v2905_v17, %v1366_v27 }
 0x327   : > { %v2935_v55 = vpop.eup %1947  ;;  %1967 = vpow2.f32 %v1305_v31 }
 0x328   : > { %v2943_v52 = vpop.eup %1949  ;;  %1969 = vpow2.f32 %v1309_v47  ;;  %v1368_v27 = vadd.f32 %v2913_v11, %v1367_v23  ;;  %v3519_v23 = vsub.f32 %v2747_v13, %v2795_v58 }
 0x329   : > { %v2950_v14 = vpop.eup %1951  ;;  %1971 = vpow2.f32 %v1313_v44  ;;  %v3520_v44 = vsub.f32 %v2753_v59, %v2795_v58 }
 0x32a   : > { %v2958_v41 = vpop.eup %1953  ;;  %1973 = vpow2.f32 %v1317_v35  ;;  %v1333_v42 = vmul.f32 1.442695, %v3519_v23  ;;  %v1369_v31 = vadd.f32 %v2920_v28, %v1368_v27  ;;  %v3521_v35 = vsub.f32 %v2759_v1, %v2795_v58 }
 0x32b   : > { %v2964_v2 = vpop.eup %1955  ;;  %1975 = vpow2.f32 %v2867_v60  ;;  %v1337_v7 = vmul.f32 1.442695, %v3520_v44  ;;  %v3522_v60 = vsub.f32 %v2765_v48, %v2795_v58  ;;  %v3526_v48 = vsub.f32 %v2783_v40, %v2795_v58 }
 0x32c   : > { %v2970_v15 = vpop.eup %1957  ;;  %1977 = vpow2.f32 %v2869_v45  ;;  %v1341_v47 = vmul.f32 1.442695, %v3521_v35  ;;  %v1370_v13 = vadd.f32 %v2928_v6, %v1369_v31  ;;  %v3523_v45 = vsub.f32 %v2771_v12, %v2795_v58 }
 0x32d   : > { %v2977_v23 = vpop.eup %1959  ;;  %1979 = vpow2.f32 %v2871_v49  ;;  %v1345_v27 = vmul.f32 1.442695, %v3522_v60  ;;  %v3524_v31 = vsub.f32 %v2777_v9, %v2795_v58 }
 0x32e   : > { %v2983_v59 = vpop.eup %1961  ;;  %1981 = vpow2.f32 %v1333_v42  ;;  %v1349_v44 = vmul.f32 1.442695, %v3523_v45  ;;  %v1371_v1 = vadd.f32 %v2935_v55, %v1370_v13  ;;  %v1357_v42 = vmul.f32 1.442695, %v3526_v48 }
 0x32f   : > { %v2989_v35 = vpop.eup %1963  ;;  %1983 = vpow2.f32 %v1337_v7  ;;  %v1353_v49 = vmul.f32 1.442695, %v3524_v31  ;;  %v3527_v13 = vsub.f32 %v2789_v39, %v2795_v58  ;;  %v3530_v58 = vsub.f32 %v2615_v54, %v2797_v38 }
 0x330   : > { %v2994_v63 = vpop.eup %1965  ;;  %1985 = vpow2.f32 %v1341_v47  ;;  %v1372_v60 = vadd.f32 %v2943_v52, %v1371_v1  ;;  %v3528_v47 = vsub.f32 %v2605_v46, %v2797_v38  ;;  %v3529_v1 = vsub.f32 %v2609_v50, %v2797_v38 }
 0x331   : > { %3525 = vst [vmem:[#allocation31_spill] sm:$0xff] %v2994_v63  ;;  %v3000_v12 = vpop.eup %1967  ;;  %1987 = vpow2.f32 %v1345_v27  ;;  %v1361_v7 = vmul.f32 1.442695, %v3527_v13  ;;  %v1247_v39 = vmul.f32 1.442695, %v3530_v58  ;;  %v3531_v46 = vsub.f32 %v2623_v57, %v2797_v38 }
 0x332   : > { %v3005_v45 = vpop.eup %1969  ;;  %1989 = vpow2.f32 %v1349_v44  ;;  %v1373_v9 = vadd.f32 %v2950_v14, %v1372_v60  ;;  %v1239_v31 = vmul.f32 1.442695, %v3528_v47  ;;  %v1243_v27 = vmul.f32 1.442695, %v3529_v1 }
 0x333   : > { %v3011_v40 = vpop.eup %1971  ;;  %1991 = vpow2.f32 %v1353_v49  ;;  %v1251_v60 = vmul.f32 1.442695, %v3531_v46  ;;  %v3532_v49 = vsub.f32 %v2630_v4, %v2797_v38  ;;  %v3533_v50 = vsub.f32 %v2636_v8, %v2797_v38 }
 0x334   : > { %v3019_v48 = vpop.eup %1973  ;;  %1993 = vpow2.f32 %v1357_v42  ;;  %v1374_v44 = vadd.f32 %v2958_v41, %v1373_v9  ;;  %v3534_v42 = vsub.f32 %v2642_v18, %v2797_v38  ;;  %v3535_v9 = vsub.f32 %v2648_v22, %v2797_v38 }
 0x335   : > { %v1255_v13 = vmul.f32 1.442695, %v3532_v49  ;;  %v3028_v47 = vpop.eup %1975  ;;  %1995 = vpow2.f32 %v1361_v7  ;;  %v1259_v54 = vmul.f32 1.442695, %v3533_v50  ;;  %v3536_v7 = vsub.f32 %v2654_v26, %v2797_v38 }
 0x336   : > { %v1263_v1 = vmul.f32 1.442695, %v3534_v42  ;;  %v1267_v57 = vmul.f32 1.442695, %v3535_v9  ;;  %v3039_v58 = vpop.eup %1977  ;;  %v1375_v4 = vadd.f32 %v2964_v2, %v1374_v44  ;;  %1997 = vpow2.f32 %v1239_v31 }
 0x337   : > { %v1271_v46 = vmul.f32 1.442695, %v3536_v7  ;;  %v3537_v8 = vsub.f32 %v2660_v30, %v2797_v38  ;;  %v3048_v50 = vpop.eup %1979  ;;  %1999 = vpow2.f32 %v1243_v27 }
 0x338   : > { %v3056_v44 = vpop.eup %1981  ;;  %v1376_v26 = vadd.f32 %v2970_v15, %v1375_v4  ;;  %2001 = vpow2.f32 %v1247_v39 }
 0x339   : > { %v1275_v49 = vmul.f32 1.442695, %v3537_v8  ;;  %v3063_v42 = vpop.eup %1983  ;;  %2003 = vpow2.f32 %v1251_v60  ;;  %v3538_v60 = vsub.f32 %v2666_v34, %v2797_v38  ;;  %v3539_v8 = vsub.f32 %v3499_v5, %v2797_v38 }
 0x33a   : > { %v3071_v4 = vpop.eup %1985  ;;  %v1377_v39 = vadd.f32 %v2977_v23, %v1376_v26  ;;  %2005 = vpow2.f32 %v1255_v13 }
 0x33b   : > { %v3078_v30 = vpop.eup %1987  ;;  %2007 = vpow2.f32 %v1259_v54  ;;  %v1279_v27 = vmul.f32 1.442695, %v3538_v60  ;;  %v1283_v7 = vmul.f32 1.442695, %v3539_v8 }
 0x33c   : > { %v3086_v26 = vpop.eup %1989  ;;  %v1378_v13 = vadd.f32 %v2983_v59, %v1377_v39  ;;  %2009 = vpow2.f32 %v1263_v1  ;;  %v3540_v1 = vsub.f32 %v3500_v10, %v2797_v38  ;;  %v3545_v10 = vsub.f32 %v3505_v0, %v2797_v38 }
 0x33d   : > { %v3094_v31 = vpop.eup %1991  ;;  %2011 = vpow2.f32 %v1267_v57  ;;  %v3541_v57 = vsub.f32 %v3501_v53, %v2797_v38  ;;  %v3544_v53 = vsub.f32 %v3504_v37, %v2797_v38  ;;  %v3548_v0 = vsub.f32 %v3508_v24, %v2797_v38 }
 0x33e   : > { %v3099_v9 = vpop.eup %1993  ;;  %v1379_v22 = vadd.f32 %v2989_v35, %v1378_v13  ;;  %2013 = vpow2.f32 %v1271_v46  ;;  %v1287_v34 = vmul.f32 1.442695, %v3540_v1  ;;  %v3542_v46 = vsub.f32 %v3502_v21, %v2797_v38 }
 0x33f   : > { %v3107_v60 = vpop.eup %1995  ;;  %2015 = vpow2.f32 %v1275_v49  ;;  %v1291_v5 = vmul.f32 1.442695, %v3541_v57  ;;  %v3543_v49 = vsub.f32 %v3503_v29, %v2797_v38  ;;  %v1303_v57 = vmul.f32 1.442695, %v3544_v53 }
 0x340   : > { %v1998_v8 = vpop.eup %1997  ;;  %v1380_v54 = vadd.f32 %v2994_v63, %v1379_v22  ;;  %2017 = vpow2.f32 %v1279_v27  ;;  %v1295_v13 = vmul.f32 1.442695, %v3542_v46  ;;  %v3546_v29 = vsub.f32 %v3506_v36, %v2797_v38 }
 0x341   : > { %v2000_v1 = vpop.eup %1999  ;;  %2019 = vpow2.f32 %v1283_v7  ;;  %v1299_v39 = vmul.f32 1.442695, %v3543_v49  ;;  %v1307_v7 = vmul.f32 1.442695, %v3545_v10  ;;  %v1319_v10 = vmul.f32 1.442695, %v3548_v0 }
 0x342   : > { %v2002_v18 = vpop.eup %2001  ;;  %v1381_v22 = vadd.f32 %v3000_v12, %v1380_v54  ;;  %2021 = vpow2.f32 %v1287_v34  ;;  %v1402_v27 = vadd.f32 %v2000_v1, %v1998_v8  ;;  %v1448_v21 = vpack.c.bf16 %v2000_v1, %v1998_v8 }
 0x343   : > { %v2004_v46 = vpop.eup %2003  ;;  %2023 = vpow2.f32 %v1291_v5  ;;  %v1311_v49 = vmul.f32 1.442695, %v3546_v29  ;;  %v3547_v5 = vsub.f32 %v3507_v25, %v2797_v38  ;;  %v3549_v36 = vpack.c.bf16 %v2889_v32, %v2881_v16 }
 0x344   : > { %v2006_v63 = vpop.eup %2005  ;;  %v1382_v37 = vadd.f32 %v3005_v45, %v1381_v22  ;;  %2025 = vpow2.f32 %v1295_v13  ;;  %v1403_v53 = vadd.f32 %v2002_v18, %v1402_v27  ;;  %1479 = vmatprep.subr.bf16.mxu1 %v1448_v21  ;;  %v1450_v54 = vpack.c.bf16 %v2004_v46, %v2002_v18 }
 0x345   : > { %v2008_v34 = vpop.eup %2007  ;;  %2027 = vpow2.f32 %v1299_v39  ;;  %v1315_v8 = vmul.f32 1.442695, %v3547_v5  ;;  %1480 = vmatpush1.bf16.msra.mxu1 %v3549_v36  ;;  %v3550_v25 = vsub.f32 %v3509_v20, %v2797_v38  ;;  %v3551_v24 = vsub.f32 %v3510_v62, %v2797_v38  ;;  %v3556_v36 = vld [vmem:[#allocation46_spill] sm:$0xff] }
 0x346   : > { %v2010_v1 = vpop.eup %2009  ;;  %v1383_v13 = vadd.f32 %v3011_v40, %v1382_v37  ;;  %2029 = vpow2.f32 %v1303_v57  ;;  %v1404_v22 = vadd.f32 %v2004_v46, %v1403_v53  ;;  %1481 = vmatprep.subr.bf16.mxu1 %v1450_v54  ;;  %v1452_v18 = vpack.c.bf16 %v2008_v34, %v2006_v63 }
 0x347   : > { %v2012_v39 = vpop.eup %2011  ;;  %2031 = vpow2.f32 %v1307_v7  ;;  %v1323_v27 = vmul.f32 1.442695, %v3550_v25  ;;  %v1327_v21 = vmul.f32 1.442695, %v3551_v24  ;;  %v3552_v46 = vsub.f32 %v3511_v61, %v2797_v38 }
 0x348   : > { %v2014_v29 = vpop.eup %2013  ;;  %v1384_v16 = vadd.f32 %v3019_v48, %v1383_v13  ;;  %2033 = vpow2.f32 %v1311_v49  ;;  %v1405_v32 = vadd.f32 %v2006_v63, %v1404_v22  ;;  %v1454_v37 = vpack.c.bf16 %v2012_v39, %v2010_v1 }
 0x349   : > { %v2016_v57 = vpop.eup %2015  ;;  %2035 = vpow2.f32 %v1315_v8  ;;  %v1331_v7 = vmul.f32 1.442695, %v3552_v46  ;;  %v3553_v20 = vsub.f32 %v3512_v33, %v2797_v38  ;;  %v3554_v62 = vpack.c.bf16 %v2905_v17, %v2897_v19 }
 0x34a   : > { %v2018_v54 = vpop.eup %2017  ;;  %v1385_v5 = vadd.f32 %v3028_v47, %v1384_v16  ;;  %2037 = vpow2.f32 %v1319_v10  ;;  %v1406_v63 = vadd.f32 %v2008_v34, %v1405_v32  ;;  %v1456_v49 = vpack.c.bf16 %v2016_v57, %v2014_v29 }
 0x34b   : > { %v1335_v53 = vmul.f32 1.442695, %v3553_v20  ;;  %1482 = vmatpush1.bf16.msra.mxu1 %v3554_v62  ;;  %v2020_v8 = vpop.eup %2019  ;;  %2039 = vpow2.f32 %v1323_v27  ;;  %v3555_v61 = vsub.f32 %v3513_v51, %v2797_v38  ;;  %v3557_v33 = vsub.f32 %v3556_v36, %v2797_v38  ;;  %v3559_v27 = vld [vmem:[#allocation48_spill] sm:$0xff] }
 0x34c   : > { %1483 = vmatprep.subr.bf16.mxu1 %v1452_v18  ;;  %v2022_v22 = vpop.eup %2021  ;;  %v1386_v19 = vadd.f32 %v3039_v58, %v1385_v5  ;;  %2041 = vpow2.f32 %v1327_v21  ;;  %v1407_v17 = vadd.f32 %v2010_v1, %v1406_v63  ;;  %v1458_v25 = vpack.c.bf16 %v2020_v8, %v2018_v54 }
 0x34d   : > { %v1339_v0 = vmul.f32 1.442695, %v3555_v61  ;;  %v1343_v13 = vmul.f32 1.442695, %v3557_v33  ;;  %v2024_v10 = vpop.eup %2023  ;;  %2043 = vpow2.f32 %v1331_v7  ;;  %v3558_v34 = vsub.f32 %v3515_v56, %v2797_v38 }
 0x34e   : > { %v3560_v51 = vsub.f32 %v3559_v27, %v2797_v38  ;;  %v3561_v16 = vpack.c.bf16 %v2920_v28, %v2913_v11  ;;  %v2026_v32 = vpop.eup %2025  ;;  %v1387_v46 = vadd.f32 %v3048_v50, %v1386_v19  ;;  %2045 = vpow2.f32 %v1335_v53 }
 0x34f   : > { %v1347_v18 = vmul.f32 1.442695, %v3558_v34  ;;  %v1408_v1 = vadd.f32 %v2012_v39, %v1407_v17  ;;  %v1460_v21 = vpack.c.bf16 %v2024_v10, %v2022_v22  ;;  %v2028_v7 = vpop.eup %2027  ;;  %2047 = vpow2.f32 %v1339_v0  ;;  %v3564_v39 = vld [vmem:[#allocation51_spill] sm:$0xff] }
 0x350   : > { %v1351_v24 = vmul.f32 1.442695, %v3560_v51  ;;  %1484 = vmatpush1.bf16.msra.mxu1 %v3561_v16  ;;  %v3562_v56 = vsub.f32 %v3517_v3, %v2797_v38  ;;  %v3563_v62 = vsub.f32 %v3518_v43, %v2797_v38  ;;  %v2030_v63 = vpop.eup %2029  ;;  %v1388_v28 = vadd.f32 %v3056_v44, %v1387_v46 }
 0x351   : > { %1485 = vmatprep.subr.bf16.mxu1 %v1454_v37  ;;  %2049 = vpow2.f32 %v1343_v13  ;;  %v1409_v11 = vadd.f32 %v2014_v29, %v1408_v1  ;;  %v1462_v61 = vpack.c.bf16 %v2028_v7, %v2026_v32  ;;  %v2032_v53 = vpop.eup %2031  ;;  %v3565_v37 = vsub.f32 %v3564_v39, %v2797_v38 }
 0x352   : > { %v1355_v20 = vmul.f32 1.442695, %v3562_v56  ;;  %v1359_v5 = vmul.f32 1.442695, %v3563_v62  ;;  %2051 = vpow2.f32 %v1347_v18  ;;  %v3566_v3 = vpack.c.bf16 %v2935_v55, %v2928_v6  ;;  %v2034_v36 = vpop.eup %2033 }
 0x353   : > { %v1363_v0 = vmul.f32 1.442695, %v3565_v37  ;;  %v1389_v43 = vadd.f32 %v3063_v42, %v1388_v28  ;;  %2053 = vpow2.f32 %v1351_v24  ;;  %v1410_v33 = vadd.f32 %v2016_v57, %v1409_v11  ;;  %v2036_v13 = vpop.eup %2035 }
 0x354   : > { %1486 = vmatpush1.bf16.msra.mxu1 %v3566_v3  ;;  %v1464_v19 = vpack.c.bf16 %v2032_v53, %v2030_v63  ;;  %2055 = vpow2.f32 %v1355_v20  ;;  %v2038_v29 = vpop.eup %2037  ;;  %v1466_v38 = vpack.c.bf16 %v2036_v13, %v2034_v36  ;;  %v3567_v55 = vpack.c.bf16 %v2950_v14, %v2943_v52 }
 0x355   : > { %1487 = vmatprep.subr.bf16.mxu1 %v1456_v49  ;;  %v1390_v17 = vadd.f32 %v3071_v4, %v1389_v43  ;;  %2057 = vpow2.f32 %v1359_v5  ;;  %v1411_v34 = vadd.f32 %v2018_v54, %v1410_v33  ;;  %v2040_v18 = vpop.eup %2039  ;;  %v3568_v56 = vpack.c.bf16 %v2964_v2, %v2958_v41 }
 0x356   : > { %2059 = vpow2.f32 %v1363_v0  ;;  %v2042_v6 = vpop.eup %2041  ;;  %v1468_v49 = vpack.c.bf16 %v2040_v18, %v2038_v29  ;;  %v3570_v43 = vpack.c.bf16 %v2989_v35, %v2983_v59  ;;  %v3574_v59 = vpack.c.bf16 %v3028_v47, %v3019_v48 }
 0x357   : > { %v1391_v27 = vadd.f32 %v3078_v30, %v1390_v17  ;;  %v1412_v57 = vadd.f32 %v2020_v8, %v1411_v34  ;;  %v2044_v51 = vpop.eup %2043  ;;  %v3571_v17 = vld [vmem:[#allocation31_spill] sm:$0xff]  ;;  %v3577_v48 = vpack.c.bf16 %v3078_v30, %v3071_v4  ;;  %v3584_v30 = vld [vmem:[#allocation21_spill] sm:$0xff] }
 0x358   : > { %1488 = vmatpush1.bf16.msra.mxu1 %v3567_v55  ;;  %v2046_v24 = vpop.eup %2045  ;;  %v1470_v1 = vpack.c.bf16 %v2044_v51, %v2042_v6  ;;  %v3583_v55 = vld [vmem:[#allocation22_spill] sm:$0xff] }
 0x359   : > { %1489 = vmatprep.subr.bf16.mxu1 %v1458_v25  ;;  %v1392_v16 = vadd.f32 %v3086_v26, %v1391_v27  ;;  %v1413_v46 = vadd.f32 %v2022_v22, %v1412_v57  ;;  %v2048_v54 = vpop.eup %2047  ;;  %v3569_v22 = vpack.c.bf16 %v2977_v23, %v2970_v15  ;;  %v3572_v15 = vpack.c.bf16 %v3000_v12, %v3571_v17  ;;  %v3587_v27 = vld [vmem:[#allocation19_spill] sm:$0xff] }
 0x35a   : > { %v1472_v62 = vpack.c.bf16 %v2048_v54, %v2046_v24  ;;  %v3575_v12 = vpack.c.bf16 %v3048_v50, %v3039_v58  ;;  %v3578_v58 = vpack.c.bf16 %v3094_v31, %v3086_v26  ;;  %v3585_v4 = vpack.c.bf16 %v3583_v55, %v3584_v30  ;;  %v3590_v26 = vld [vmem:[#allocation25_spill] sm:$0xff] }
 0x35b   : > { %v2050_v20 = vpop.eup %2049  ;;  %v1393_v14 = vadd.f32 %v3094_v31, %v1392_v16  ;;  %v1414_v52 = vadd.f32 %v2024_v10, %v1413_v46  ;;  %v3589_v31 = vld [vmem:[#allocation26_spill] sm:$0xff]  ;;  %v3596_v16 = vld [vmem:[#allocation28_spill] sm:$0xff] }
 0x35c   : > { %1490 = vmatpush1.bf16.msra.mxu1 %v3568_v56  ;;  %v2052_v8 = vpop.eup %2051 }
 0x35d   : > { %1491 = vmatprep.subr.bf16.mxu1 %v1460_v21  ;;  %v2054_v25 = vpop.eup %2053  ;;  %v1394_v5 = vadd.f32 %v3099_v9, %v1393_v14  ;;  %v1415_v28 = vadd.f32 %v2026_v32, %v1414_v52  ;;  %v1474_v11 = vpack.c.bf16 %v2052_v8, %v2050_v20 }
 0x35e   : > { %v2056_v39 = vpop.eup %2055 }
 0x35f   : > { %v2058_v37 = vpop.eup %2057  ;;  %v1395_v2 = vadd.f32 %v3107_v60, %v1394_v5  ;;  %v1416_v41 = vadd.f32 %v2028_v7, %v1415_v28  ;;  %v1476_v0 = vpack.c.bf16 %v2056_v39, %v2054_v25  ;;  %v3573_v7 = vpack.c.bf16 %v3011_v40, %v3005_v45 }
 0x360   : > { %1492 = vmatpush1.bf16.msra.mxu1 %v3569_v22  ;;  %v2060_v10 = vpop.eup %2059  ;;  %v3576_v45 = vpack.c.bf16 %v3063_v42, %v3056_v44  ;;  %v3579_v44 = vpack.c.bf16 %v3107_v60, %v3099_v9  ;;  %v3580_v42 = vld [vmem:[#allocation18_spill] sm:$0xff] }
 0x361   : > { %1493 = vmatprep.subr.bf16.mxu1 %v1462_v61  ;;  %v1417_v21 = vadd.f32 %v2030_v63, %v1416_v41  ;;  %v1478_v3 = vpack.c.bf16 %v2060_v10, %v2058_v37  ;;  %v3595_v60 = vld [vmem:[#allocation30_spill] sm:$0xff]  ;;  %v3253_v41 = vstv %s1554_s10 }
 0x362   : > { %v3597_v46 = vpack.c.bf16 %v3595_v60, %v3596_v16 }
 0x363   : > { %v1418_v32 = vadd.f32 %v2032_v53, %v1417_v21  ;;  %v1589_v21 = vld [vmem:[%s2453_s0 + $0x8] sm:$0xff] }
 0x364   : > { %1494 = vmatpush1.bf16.msra.mxu1 %v3570_v43 }
 0x365   : > { %1495 = vmatprep.subr.bf16.mxu1 %v1464_v19  ;;  %v1419_v33 = vadd.f32 %v2034_v36, %v1418_v32 }
 0x367   : > { %v1420_v23 = vadd.f32 %v2036_v13, %v1419_v33 }
 0x368   : > { %1496 = vmatpush1.bf16.msra.mxu1 %v3572_v15 }
 0x369   : > { %1497 = vmatprep.subr.bf16.mxu1 %v1466_v38  ;;  %v1421_v34 = vadd.f32 %v2038_v29, %v1420_v23  ;;  %v3581_v38 = vld [vmem:[#allocation17_spill] sm:$0xff] }
 0x36b   : > { %v1422_v63 = vadd.f32 %v2040_v18, %v1421_v34  ;;  %v3582_v18 = vpack.c.bf16 %v3580_v42, %v3581_v38 }
 0x36c   : > { %1498 = vmatpush1.bf16.msra.mxu1 %v3573_v7 }
 0x36d   : > { %1499 = vmatprep.subr.bf16.mxu1 %v1468_v49  ;;  %v1423_v61 = vadd.f32 %v2042_v6, %v1422_v63  ;;  %v3586_v6 = vld [vmem:[#allocation20_spill] sm:$0xff]  ;;  %v3591_v49 = vpack.c.bf16 %v3589_v31, %v3590_v26  ;;  %v1598_v63 = vunpack.c.l.bf16 %v1589_v21 }
 0x36e   : > { %v3588_v57 = vpack.c.bf16 %v3586_v6, %v3587_v27 }
 0x36f   : > { %v1424_v35 = vadd.f32 %v2044_v51, %v1423_v61  ;;  %v3592_v51 = vld [vmem:[#allocation24_spill] sm:$0xff] }
 0x370   : > { %1500 = vmatpush1.bf16.msra.mxu1 %v3574_v59 }
 0x371   : > { %1501 = vmatprep.subr.bf16.mxu1 %v1470_v1  ;;  %v1425_v53 = vadd.f32 %v2046_v24, %v1424_v35  ;;  %v3593_v24 = vld [vmem:[#allocation23_spill] sm:$0xff]  ;;  %v3598_v1 = vld [vmem:[#allocation29_spill] sm:$0xff] }
 0x372   : > { %v3594_v9 = vpack.c.bf16 %v3592_v51, %v3593_v24 }
 0x373   : > { %v1426_v36 = vadd.f32 %v2048_v54, %v1425_v53  ;;  %v3599_v54 = vld [vmem:[#allocation27_spill] sm:$0xff]  ;;  %v1599_v53 = vunpack.c.h.bf16 %v1589_v21 }
 0x374   : > { %1502 = vmatpush1.bf16.msra.mxu1 %v3575_v12  ;;  %v3600_v56 = vpack.c.bf16 %v3598_v1, %v3599_v54  ;;  %v1593_v1 = vld [vmem:[%s2453_s0 + $0x28] sm:$0xff] }
 0x375   : > { %1503 = vmatprep.subr.bf16.mxu1 %v1472_v62  ;;  %v1427_v19 = vadd.f32 %v2050_v20, %v1426_v36  ;;  %v1396_v20 = vrot.slane %v1395_v2, 4 }
 0x377   : > { %v1428_v40 = vadd.f32 %v2052_v8, %v1427_v19  ;;  %v1397_v52 = vadd.f32 %v1396_v20, %v1395_v2 }
 0x378   : > { %1504 = vmatpush1.bf16.msra.mxu1 %v3576_v45 }
 0x379   : > { %1505 = vmatprep.subr.bf16.mxu1 %v1474_v11  ;;  %v1429_v13 = vadd.f32 %v2054_v25, %v1428_v40  ;;  %v1398_v8 = vrot.slane %v1397_v52, 2  ;;  %v1590_v40 = vld [vmem:[%s2453_s0 + $0x10] sm:$0xff] }
 0x37a   : > { %v1601_v38 = vunpack.c.h.bf16 %v1590_v40 }
 0x37b   : > { %v1430_v47 = vadd.f32 %v2056_v39, %v1429_v13  ;;  %v1399_v5 = vadd.f32 %v1398_v8, %v1397_v52 }
 0x37c   : > { %1506 = vmatpush1.bf16.msra.mxu1 %v3577_v48 }
 0x37d   : > { %1507 = vmatprep.subr.bf16.mxu1 %v1476_v0  ;;  %v1431_v29 = vadd.f32 %v2058_v37, %v1430_v47  ;;  %v1400_v11 = vrot.slane %v1399_v5, 1  ;;  %v1588_v0 = vld [vmem:[%s2453_s0] sm:$0xff] }
 0x37e   : > { %v1597_v17 = vunpack.c.h.bf16 %v1588_v0 }
 0x37f   : > { %v1432_v50 = vadd.f32 %v2060_v10, %v1431_v29  ;;  %v1401_v22 = vadd.f32 %v1400_v11, %v1399_v5  ;;  %v1591_v29 = vld [vmem:[%s2453_s0 + $0x18] sm:$0xff]  ;;  %v1606_v5 = vunpack.c.l.bf16 %v1593_v1 }
 0x380   : > { %1508 = vmatpush1.bf16.msra.mxu1 %v3578_v58  ;;  %v1603_v31 = vunpack.c.h.bf16 %v1591_v29 }
 0x381   : > { %1509 = vmatprep.subr.bf16.mxu1 %v1478_v3  ;;  %v1433_v14 = vrot.slane %v1432_v50, 4  ;;  %2061 = vrcp.f32 %v1401_v22  ;;  %v1596_v3 = vunpack.c.l.bf16 %v1588_v0  ;;  %v1607_v22 = vunpack.c.h.bf16 %v1593_v1 }
 0x383   : > { %v1434_v62 = vadd.f32 %v1433_v14, %v1432_v50  ;;  %v1600_v50 = vunpack.c.l.bf16 %v1590_v40 }
 0x384   : > { %1510 = vmatpush1.bf16.msra.mxu1 %v3579_v44 }
 0x385   : > { %v1435_v25 = vrot.slane %v1434_v62, 2 }
 0x387   : > { %1512 = vmatmul.mubr.bf16.vlgmr.msra.gmra.mrb[20].mxu1 %v3582_v18  ;;  %v1436_v28 = vadd.f32 %v1435_v25, %v1434_v62 }
 0x388   : > { %1521 = vmatprep.mubr.bf16.mxu1 %v3585_v4  ;;  %v1602_v4 = vunpack.c.l.bf16 %v1591_v29 }
 0x389   : > { %v1437_v39 = vrot.slane %v1436_v28, 1 }
 0x38b   : > { %v1438_v37 = vadd.f32 %v1437_v39, %v1436_v28  ;;  %v3259_v32 = vpop.eup %2061 }
 0x38d   : > { %2063 = vrcp.f32 %v1438_v37 }
 0x38f   : > { %1522 = vmatmul.mubr.bf16.gmra.mrb[24].mxu1 %v3588_v57 }
 0x390   : > { %1531 = vmatprep.mubr.bf16.mxu1 %v3591_v49 }
 0x397   : > { %1532 = vmatmul.mubr.bf16.gmra.mrb[28].mxu1 %v3594_v9  ;;  %v3262_v23 = vpop.eup %2063  ;;  %v1592_v9 = vld [vmem:[%s2453_s0 + $0x20] sm:$0xff] }
 0x398   : > { %1541 = vmatprep.mubr.bf16.mxu1 %v3597_v46  ;;  %v1605_v52 = vunpack.c.h.bf16 %v1592_v9 }
 0x39f   : > { %1542 = vmatmul.mubr.bf16.gmra.mrb[32].mxu1 %v3600_v56  ;;  %v1604_v56 = vunpack.c.l.bf16 %v1592_v9 }
 0x45a   : > { %v1513_v10 = vpop.f32.mrb[20].mxu1 }
 0x45b   : > { %v1556_v2 = vmul.f32 %v3253_v41, %v1513_v10  ;;  %v1515_v43 = vpop.f32.mrb[21].mxu1 }
 0x45c   : > { %v1557_v33 = vmul.f32 %v3253_v41, %v1515_v43  ;;  %v1517_v15 = vpop.f32.mrb[22].mxu1 }
 0x45d   : > { %v1572_v34 = vmul.f32 %v3259_v32, %v1556_v2  ;;  %v1558_v7 = vmul.f32 %v3253_v41, %v1517_v15  ;;  %v1519_v61 = vpop.f32.mrb[23].mxu1  ;;  %v1594_v2 = vld [vmem:[%s2453_s0 + $0x30] sm:$0xff] }
 0x45e   : > { %v1573_v59 = vmul.f32 %v3262_v23, %v1557_v33  ;;  %v1559_v35 = vmul.f32 %v3253_v41, %v1519_v61  ;;  %v1609_v61 = vunpack.c.h.bf16 %v1594_v2 }
 0x45f   : > { %v1612_v12 = vadd.f32 %v1596_v3, %v1572_v34  ;;  %v1574_v36 = vmul.f32 %v3259_v32, %v1558_v7  ;;  %v1608_v34 = vunpack.c.l.bf16 %v1594_v2 }
 0x460   : > { %v1613_v19 = vadd.f32 %v1597_v17, %v1573_v59  ;;  %v1575_v45 = vmul.f32 %v3262_v23, %v1559_v35  ;;  %v1595_v17 = vld [vmem:[%s2453_s0 + $0x38] sm:$0xff]  ;;  %s1840_s0 = sshll.u32 %s2203_s14, 11  ;;  %s1645_s14 = scalar_lea.sflag [#allocation7], %s2442_s20 }
 0x461   : > { %1628 = vst [vmem:[%s3271_s24] sm:$0xff] %v1612_v12  ;;  %v1614_v13 = vadd.f32 %v1598_v63, %v1574_v36  ;;  %v1610_v12 = vunpack.c.l.bf16 %v1595_v17  ;;  %v1611_v40 = vunpack.c.h.bf16 %v1595_v17  ;;  %s3320_s30 = scalar_lea.hbm %s3383_s9, %s1840_s0 }
 0x462   : > { %1629 = vst [vmem:[%s3271_s24 + $0x8] sm:$0xff] %v1613_v19  ;;  %v1615_v48 = vadd.f32 %v1599_v53, %v1575_v45  ;;  %v1523_v47 = vpop.f32.mrb[24].mxu1 }
 0x463   : > { %1630 = vst [vmem:[%s3271_s24 + $0x10] sm:$0xff] %v1614_v13  ;;  %v1560_v58 = vmul.f32 %v3253_v41, %v1523_v47  ;;  %v1525_v44 = vpop.f32.mrb[25].mxu1 }
 0x464   : > { %1631 = vst [vmem:[%s3271_s24 + $0x18] sm:$0xff] %v1615_v48  ;;  %v1561_v42 = vmul.f32 %v3253_v41, %v1525_v44  ;;  %v1527_v18 = vpop.f32.mrb[26].mxu1 }
 0x465   : > { %v1576_v55 = vmul.f32 %v3259_v32, %v1560_v58  ;;  %v1562_v30 = vmul.f32 %v3253_v41, %v1527_v18  ;;  %v1529_v6 = vpop.f32.mrb[27].mxu1 }
 0x466   : > { %v1577_v27 = vmul.f32 %v3262_v23, %v1561_v42  ;;  %v1563_v57 = vmul.f32 %v3253_v41, %v1529_v6 }
 0x467   : > { %v1616_v26 = vadd.f32 %v1600_v50, %v1576_v55  ;;  %v1578_v49 = vmul.f32 %v3259_v32, %v1562_v30 }
 0x468   : > { %v1617_v51 = vadd.f32 %v1601_v38, %v1577_v27  ;;  %v1579_v24 = vmul.f32 %v3262_v23, %v1563_v57 }
 0x469   : > { %1632 = vst [vmem:[%s3271_s24 + $0x20] sm:$0xff] %v1616_v26  ;;  %v1618_v60 = vadd.f32 %v1602_v4, %v1578_v49 }
 0x46a   : > { %1633 = vst [vmem:[%s3271_s24 + $0x28] sm:$0xff] %v1617_v51  ;;  %v1619_v16 = vadd.f32 %v1603_v31, %v1579_v24  ;;  %v1533_v46 = vpop.f32.mrb[28].mxu1 }
 0x46b   : > { %1634 = vst [vmem:[%s3271_s24 + $0x30] sm:$0xff] %v1618_v60  ;;  %v1564_v54 = vmul.f32 %v3253_v41, %v1533_v46  ;;  %v1535_v20 = vpop.f32.mrb[29].mxu1 }
 0x46c   : > { %1635 = vst [vmem:[%s3271_s24 + $0x38] sm:$0xff] %v1619_v16  ;;  %v1565_v14 = vmul.f32 %v3253_v41, %v1535_v20  ;;  %v1537_v62 = vpop.f32.mrb[30].mxu1 }
 0x46d   : > { %v1580_v8 = vmul.f32 %v3259_v32, %v1564_v54  ;;  %v1566_v25 = vmul.f32 %v3253_v41, %v1537_v62  ;;  %v1539_v28 = vpop.f32.mrb[31].mxu1 }
 0x46e   : > { %v1581_v11 = vmul.f32 %v3262_v23, %v1565_v14  ;;  %v1567_v39 = vmul.f32 %v3253_v41, %v1539_v28 }
 0x46f   : > { %v1620_v37 = vadd.f32 %v1604_v56, %v1580_v8  ;;  %v1582_v0 = vmul.f32 %v3259_v32, %v1566_v25 }
 0x470   : > { %v1621_v10 = vadd.f32 %v1605_v52, %v1581_v11  ;;  %v1583_v21 = vmul.f32 %v3262_v23, %v1567_v39 }
 0x471   : > { %1636 = vst [vmem:[%s3271_s24 + $0x40] sm:$0xff] %v1620_v37  ;;  %v1622_v3 = vadd.f32 %v1606_v5, %v1582_v0 }
 0x472   : > { %1637 = vst [vmem:[%s3271_s24 + $0x48] sm:$0xff] %v1621_v10  ;;  %v1623_v43 = vadd.f32 %v1607_v22, %v1583_v21  ;;  %v1543_v33 = vpop.f32.mrb[32].mxu1 }
 0x473   : > { %1638 = vst [vmem:[%s3271_s24 + $0x50] sm:$0xff] %v1622_v3  ;;  %v1568_v15 = vmul.f32 %v3253_v41, %v1543_v33  ;;  %v1545_v7 = vpop.f32.mrb[33].mxu1 }
 0x474   : > { %1639 = vst [vmem:[%s3271_s24 + $0x58] sm:$0xff] %v1623_v43  ;;  %v1569_v63 = vmul.f32 %v3253_v41, %v1545_v7  ;;  %v1547_v59 = vpop.f32.mrb[34].mxu1 }
 0x475   : > { %v1584_v35 = vmul.f32 %v3259_v32, %v1568_v15  ;;  %v1570_v53 = vmul.f32 %v3253_v41, %v1547_v59  ;;  %v1549_v36 = vpop.f32.mrb[35].mxu1 }
 0x476   : > { %v1585_v19 = vmul.f32 %v3262_v23, %v1569_v63  ;;  %v1571_v45 = vmul.f32 %v3253_v41, %v1549_v36 }
 0x477   : > { %v1624_v13 = vadd.f32 %v1608_v34, %v1584_v35  ;;  %v1586_v48 = vmul.f32 %v3259_v32, %v1570_v53 }
 0x478   : > { %v1625_v47 = vadd.f32 %v1609_v61, %v1585_v19  ;;  %v1587_v29 = vmul.f32 %v3262_v23, %v1571_v45 }
 0x479   : > { %1640 = vst [vmem:[%s3271_s24 + $0x60] sm:$0xff] %v1624_v13  ;;  %v1626_v58 = vadd.f32 %v1610_v12, %v1586_v48 }
 0x47a   : > { %1641 = vst [vmem:[%s3271_s24 + $0x68] sm:$0xff] %v1625_v47  ;;  %v1627_v41 = vadd.f32 %v1611_v40, %v1587_v29 }
 0x47b   : > { %1642 = vst [vmem:[%s3271_s24 + $0x70] sm:$0xff] %v1626_v58 }
 0x47c   : > { %1643 = vst [vmem:[%s3271_s24 + $0x78] sm:$0xff] %v1627_v41 }
 0x47d   : > { %2138 = shalt.err (!%p2135_p11)
}
 0x47e   : > { %s2139_s26 = scalar_lea.hbm %s3320_s30, 2048  ;;  %s2143_s10 = scalar_lea.hbm %s3383_s9, 4096 }
 0x47f   : > { %p2140_p1 = scmp.ne.s32.totalorder %s3320_s30, %s2139_s26  ;;  %p2144_p5 = scmp.lt.u32.totalorder %s3320_s30, %s3383_s9 }
 0x480   : > { %p2145_p4 = scmp.lt.u32.totalorder %s2143_s10, %s2139_s26  ;;  %p2147_p0 = scmp.lt.u32.totalorder %s2139_s26, %s3320_s30 }
 0x481   : > { %p2141_p6 = pnand %p2140_p1, %p3601_p3 }
 0x482   : > { %p2146_p8 = por %p2145_p4, %p2144_p5 }
 0x483   : > { %p2142_p2 = pneg %p2141_p6 }
 0x484   : > { %p2148_p12 = por %p2147_p0, %p2146_p8 }
 0x486   : > { %p2149_p13 = pnand %p2148_p12, %p2142_p2 }
 0x488   : > { %2152 = shalt.err (!%p2149_p13)
}
 0x489   : > { %s2219_s0 = smov 256   ;;  %s2220_s28 = smov 16  }
 0x48a   : > { %1847 = dma.vmem_to_hbm [thread:$0]  (%p3601_p3), %s3322_s21, 2048, %s3320_s30, %s1645_s14, %s2219_s0, %s2219_s0, %s2220_s28  }
 0x48b PF: > { %s1675_s17 = sand.u32 1, %s2191_s11   ;;  %p3602_p7 = scmp.ne.s32.totalorder %s3454_s25, 0 }
 0x48c   : > { %p3603_p10 = scmp.ge.s32.totalorder %s2211_s16, 2  ;;  %s1676_s7 = scalar_lea.sflag [#allocation7], %s1675_s17 }
 0x48e   : > { %p1857_p9 = pnand %p3603_p10, %p3602_p7 }
 0x490   : > { %2186 = dma.done.wait (!%p1857_p9), %s1676_s7, 2048  }
 0x491   : > { %2188 = vsyncadd (!%p1857_p9), %s1676_s7, 4294965248  ;;  %s29_s16 = sadd.s32 1, %s2211_s16   ;;  %s3604_s19 = sld [smem:[#allocation14_spill]] }
 0x492   : > { %p26_p11 = scmp.ge.s32.totalorder %s29_s16, 4   ;;  %s3605_s13 = sld [smem:[#allocation16_spill]] }
 0x493   : > { %s3606_s23 = sld [smem:[#allocation15_spill]]  ;;  %s3607_s11 = smov %s2195_s12 }
 0x494   : > { %s3609_s14 = smov %s2207_s15  ;;  %28 = sbr.rel (!%p26_p11) target bundleno = 11 (0xb), region = 119 }
 0x497   : > { %s3608_s12 = smov %s3604_s19 }
 0x499   : > { %s3610_s15 = smov %s3606_s23 }
 0x49b   :  { %1681 = vsyncpa [#allocation6], 1 }
 0x49c   :  { %1683 = vsyncpa [#allocation6 + $0x1], 1 }
 0x49d   :  { %1684 = vsyncpa [#allocation9], 1 }
 0x49e   :  { %1686 = vsyncpa [#allocation9 + $0x1], 1 }
 0x49f   :  { %1687 = vsyncpa [#allocation7], 1 }
 0x4a0   :  { %1689 = vsyncpa [#allocation7 + $0x1], 1 }

</bundles_post_ra>
